<compile_context>
chip_gen: v7x
topology: tpu7x:2x2x1
jax: 0.10.0
libtpu: 0.0.40
codegen_flags: <defaults>
</compile_context>

<pallas_src>
import math

import jax
import jax.numpy as jnp
from jax.experimental import pallas as pl
from jax.experimental.pallas import tpu as pltpu


def _round_up(x: int, m: int) -> int:
    return (x + m - 1) // m * m


# --------------------------------------------------------------------------
# Prep kernel: per-layer small matmuls (W_conv folded into the RHS, and the
# parallel Linear branch + bias precomputed so the big kernel's epilogue is
# just scale + add + cast).
# --------------------------------------------------------------------------
def _prep_kernel(h_ref, ssrc_ref, wc_ref, wl_ref, b_ref, hw_ref, lin_ref):
    h32 = h_ref[...].astype(jnp.float32)                      # (tp, Fi)
    hs = h32 * ssrc_ref[...]                                  # fold D_src^{-1/2}
    hw_ref[...] = jnp.dot(hs, wc_ref[...],
                          preferred_element_type=jnp.float32).astype(hw_ref.dtype)
    lin_ref[...] = (jnp.dot(h32, wl_ref[...],
                            preferred_element_type=jnp.float32)
                    + b_ref[...]).astype(lin_ref.dtype)


def gcn_prep(h, s_src, w_conv, w_lin, bias, *, tp):
    n_p, f_in_p = h.shape
    f_out_p = w_conv.shape[1]
    return pl.pallas_call(
        _prep_kernel,
        out_shape=(jax.ShapeDtypeStruct((n_p, f_out_p), jnp.bfloat16),
                   jax.ShapeDtypeStruct((n_p, f_out_p), jnp.float32)),
        grid_spec=pltpu.PrefetchScalarGridSpec(
            num_scalar_prefetch=0,
            grid=(n_p // tp,),
            in_specs=[
                pl.BlockSpec((tp, f_in_p), lambda i: (i, 0)),      # h (bf16)
                pl.BlockSpec((tp, 1), lambda i: (i, 0)),           # D_src^{-1/2}
                pl.BlockSpec((f_in_p, f_out_p), lambda i: (0, 0)),  # W_conv (resident)
                pl.BlockSpec((f_in_p, f_out_p), lambda i: (0, 0)),  # W_lin  (resident)
                pl.BlockSpec((1, f_out_p), lambda i: (0, 0)),       # bias   (resident)
            ],
            out_specs=[pl.BlockSpec((tp, f_out_p), lambda i: (i, 0)),
                       pl.BlockSpec((tp, f_out_p), lambda i: (i, 0))],
        ),
        compiler_params=pltpu.CompilerParams(
            dimension_semantics=("parallel",),
        ),
    )(h, s_src, w_conv, w_lin, bias)


# --------------------------------------------------------------------------
# Aggregation kernel: out = s_dst * (A @ hw) + lin
#   A streamed as binary int8, cast to bf16 in-kernel (HBM-bound -> cast is
#   hidden), bf16 x bf16 MXU matmul with f32 accumulation.
# --------------------------------------------------------------------------
def _agg_kernel(a_ref, hw_ref, lin_ref, sdst_ref, o_ref, acc_ref):
    k = pl.program_id(1)

    @pl.when(k == 0)
    def _init():
        acc_ref[...] = jnp.zeros_like(acc_ref)

    acc_ref[...] += jnp.dot(a_ref[...].astype(jnp.bfloat16), hw_ref[...],
                            preferred_element_type=jnp.float32)

    @pl.when(k == pl.num_programs(1) - 1)
    def _epilogue():
        # fold D_dst^{-1/2} here (after aggregation, before the additive branch)
        o_ref[...] = (sdst_ref[...] * acc_ref[...] + lin_ref[...]).astype(o_ref.dtype)


def gcn_aggregate(a_int8, hw, lin, s_dst, *, tm, tk, out_dtype):
    n_p = a_int8.shape[0]
    f_out_p = hw.shape[1]
    grid = (n_p // tm, n_p // tk)

    # Derive the VMEM limit from the actual (double-buffered) footprint, with
    # headroom; stays well under v7x's 64 MiB even at tm=2048.
    out_bytes = jnp.dtype(out_dtype).itemsize
    footprint = (2 * (tm * tk * 1            # A tile (int8), 2 buffers
                      + tk * f_out_p * 2     # hw tile (bf16)
                      + tm * f_out_p * 4     # lin tile (f32)
                      + tm * 4               # s_dst tile (f32)
                      + tm * f_out_p * out_bytes)  # output tile
                 + tm * f_out_p * 4)          # accumulator scratch
    vmem_limit = int(min(48 * 1024 * 1024, max(32 * 1024 * 1024, 2 * footprint)))

    return pl.pallas_call(
        _agg_kernel,
        out_shape=jax.ShapeDtypeStruct((n_p, f_out_p), out_dtype),
        grid_spec=pltpu.PrefetchScalarGridSpec(
            num_scalar_prefetch=0,
            grid=grid,
            in_specs=[
                # binary adjacency: dominant streamed operand, 1 B/elem
                pl.BlockSpec((tm, tk), lambda i, k: (i, k)),
                # pre-multiplied features (h @ W_conv), blocked along k
                pl.BlockSpec((tk, f_out_p), lambda i, k: (k, 0)),
                # precomputed linear branch, fetched once per row tile
                pl.BlockSpec((tm, f_out_p), lambda i, k: (i, 0)),
                # D_dst^{-1/2} per-row scale, fetched once per row tile
                pl.BlockSpec((tm, 1), lambda i, k: (i, 0)),
            ],
            out_specs=pl.BlockSpec((tm, f_out_p), lambda i, k: (i, 0)),
            scratch_shapes=[pltpu.VMEM((tm, f_out_p), jnp.float32)],
        ),
        compiler_params=pltpu.CompilerParams(
            dimension_semantics=("parallel", "arbitrary"),
            vmem_limit_bytes=vmem_limit,
        ),
    )(a_int8, hw, lin, s_dst)


# --------------------------------------------------------------------------
# Full forward pass.
# --------------------------------------------------------------------------
def gcn_forward(adj, feat, params, *, tm=1024, tk=512):
    """adj: dense (N_dst, N_src) binary adjacency, adj[i, j] = 1 iff edge j -> i.
    params: list of (W_conv (Fin,Fout), W_lin (Fin,Fout), bias (Fout,)) per layer.
    tm, tk should be powers of two (keeps padding = lcm(tm, tk) minimal)."""
    n, f_in = feat.shape

    # ---- tile sizes / padded node count --------------------------------
    n128 = _round_up(n, 128)
    tm = max(128, min(tm, n128))
    tk = max(128, min(tk, n128))
    n_p = _round_up(n, (tm * tk) // math.gcd(tm, tk))
    # give both v7x TensorCores work on the "parallel" row axis when possible
    while n_p // tm < 2 and tm >= 256:
        tm //= 2

    # ---- one-time graph preprocessing (reused by every layer) ----------
    # Norms are folded OUT of the adjacency so the big streamed operand stays
    # exactly binary -> store it as int8 (no N^2 f32 a_hat temp, half the bytes).
    adj_f = adj.astype(jnp.float32)
    deg_dst = jnp.maximum(adj_f.sum(axis=1), 1.0)   # in-degrees  (destination)
    deg_src = jnp.maximum(adj_f.sum(axis=0), 1.0)   # out-degrees (source)
    s_dst = jnp.pad(deg_dst ** -0.5, (0, n_p - n)).reshape(n_p, 1).astype(jnp.float32)
    s_src = jnp.pad(deg_src ** -0.5, (0, n_p - n)).reshape(n_p, 1).astype(jnp.float32)
    a_int8 = jnp.pad(adj_f, ((0, n_p - n), (0, n_p - n))).astype(jnp.int8)

    f_in_p = _round_up(f_in, 128)
    h = jnp.pad(feat.astype(jnp.float32),
                ((0, n_p - n), (0, f_in_p - f_in))).astype(jnp.bfloat16)

    n_layers = len(params)
    for li, (w_conv, w_lin, b) in enumerate(params):
        fi, fo = w_conv.shape
        fi_p, fo_p = _round_up(fi, 128), _round_up(fo, 128)
        w_c = jnp.pad(w_conv.astype(jnp.float32), ((0, fi_p - fi), (0, fo_p - fo)))
        w_l = jnp.pad(w_lin.astype(jnp.float32), ((0, fi_p - fi), (0, fo_p - fo)))
        b_p = jnp.pad(b.reshape(1, -1).astype(jnp.float32), ((0, 0), (0, fo_p - fo)))

        hw, lin = gcn_prep(h, s_src, w_c, w_l, b_p, tp=tm)
        out_dtype = jnp.float32 if li == n_layers - 1 else jnp.bfloat16
        h = gcn_aggregate(a_int8, hw, lin, s_dst, tm=tm, tk=tk, out_dtype=out_dtype)

    f_out_last = params[-1][0].shape[1]
    return h[:n, :f_out_last]


def gcn_reference(adj, feat, params):
    """Plain-JAX reference mirroring the kernel's bf16 quantization points."""
    adj_f = adj.astype(jnp.float32)
    deg_dst = jnp.maximum(adj_f.sum(axis=1), 1.0)
    deg_src = jnp.maximum(adj_f.sum(axis=0), 1.0)
    s_dst = (deg_dst ** -0.5)[:, None]
    s_src = (deg_src ** -0.5)[:, None]
    h = feat.astype(jnp.bfloat16)
    n_layers = len(params)
    for li, (wc, wl, b) in enumerate(params):
        h32 = h.astype(jnp.float32)
        hw = ((s_src * h32) @ wc).astype(jnp.bfloat16).astype(jnp.float32)
        conv = s_dst * (adj_f @ hw)
        lin = h32 @ wl + b[None, :]
        out = conv + lin
        h = out.astype(jnp.float32 if li == n_layers - 1 else jnp.bfloat16)
    return h.astype(jnp.float32)


def make_params(key, in_feats, n_hidden, n_classes, n_layers):
    params = []
    for i in range(n_layers):
        in_h = n_hidden if i > 0 else in_feats
        out_h = n_hidden if i < n_layers - 1 else n_classes
        key, k1, k2 = jax.random.split(key, 3)
        w_conv = 0.1 * jax.random.normal(k1, (in_h, out_h), jnp.float32)
        w_lin = 0.1 * jax.random.normal(k2, (in_h, out_h), jnp.float32)
        # dgl GraphConv zero-inits its bias; only the last layer has one, and a
        # zero bias on the other layers is semantically identical to "no bias".
        bias = jnp.zeros((out_h,), jnp.float32)
        params.append((w_conv, w_lin, bias))
    return params


if __name__ == "__main__":
    # small synthetic graph consistent with the module; N is deliberately not a
    # tile multiple so the padding path is exercised (n_p = 1024, grid (2, 4)).
    N = 1000
    IN_FEATS = 32
    N_HIDDEN = 32
    N_CLASSES = 8
    N_LAYERS = 3

    key = jax.random.PRNGKey(0)
    k_adj, k_feat, k_par = jax.random.split(key, 3)

    # random symmetric binary adjacency with self-loops, (N_dst, N_src)
    raw = jax.random.bernoulli(k_adj, p=0.02, shape=(N, N)).astype(jnp.float32)
    adj = jnp.maximum(raw, raw.T)
    adj = jnp.maximum(adj, jnp.eye(N, dtype=jnp.float32))

    feat = jax.random.normal(k_feat, (N, IN_FEATS), jnp.float32)
    params = make_params(k_par, IN_FEATS, N_HIDDEN, N_CLASSES, N_LAYERS)

    out = gcn_forward(adj, feat, params, tm=512, tk=256)
    out = jax.block_until_ready(out)
    assert out.shape == (N, N_CLASSES)
    assert out.dtype == jnp.float32

    # correctness check against a plain-JAX reference with matching precision
    ref = gcn_reference(adj, feat, params)
    err = float(jnp.max(jnp.abs(out - ref)))
    scale = float(jnp.max(jnp.abs(ref))) + 1e-6
    assert err / scale < 2e-2, f"kernel/reference mismatch: max abs err {err}"

    print("KERNEL_OK")
</pallas_src>

<mosaic_0001>
module attributes {stable_mosaic.version = 11 : i64} {
  func.func @_prep_kernel(%arg0: i32, %arg1: memref<512x128xbf16, #tpu.memory_space<vmem>>, %arg2: memref<512x1xf32, #tpu.memory_space<vmem>>, %arg3: memref<128x128xf32, #tpu.memory_space<vmem>>, %arg4: memref<128x128xf32, #tpu.memory_space<vmem>>, %arg5: memref<1x128xf32, #tpu.memory_space<vmem>>, %arg6: memref<512x128xbf16, #tpu.memory_space<vmem>>, %arg7: memref<512x128xf32, #tpu.memory_space<vmem>>) attributes {dimension_semantics = [#tpu.dimension_semantics<parallel>], iteration_bounds = array<i64: 2>, scalar_prefetch = 0 : i64, scratch_operands = 0 : i64, tpu.core_type = #tpu.core_type<tc>, window_params = [{transform_indices = @transform_0, window_bounds = array<i64: 512, 128>}, {transform_indices = @transform_1, window_bounds = array<i64: 512, 1>}, {pipeline_mode = #tpu.pipeline_mode<synchronous>, transform_indices = @transform_2, window_bounds = array<i64: 128, 128>}, {pipeline_mode = #tpu.pipeline_mode<synchronous>, transform_indices = @transform_3, window_bounds = array<i64: 128, 128>}, {pipeline_mode = #tpu.pipeline_mode<synchronous>, transform_indices = @transform_4, window_bounds = array<i64: 1, 128>}, {transform_indices = @transform_5, window_bounds = array<i64: 512, 128>}, {transform_indices = @transform_6, window_bounds = array<i64: 512, 128>}]} {
    %c0 = arith.constant 0 : index
    %c0_0 = arith.constant 0 : index
    %0 = vector.load %arg1[%c0, %c0_0] : memref<512x128xbf16, #tpu.memory_space<vmem>>, vector<512x128xbf16>
    %1 = arith.extf %0 : vector<512x128xbf16> to vector<512x128xf32>
    %c0_1 = arith.constant 0 : index
    %c0_2 = arith.constant 0 : index
    %2 = vector.load %arg2[%c0_1, %c0_2] : memref<512x1xf32, #tpu.memory_space<vmem>>, vector<512x1xf32>
    %3 = vector.broadcast %2 : vector<512x1xf32> to vector<512x128xf32>
    %4 = arith.mulf %1, %3 : vector<512x128xf32>
    %c0_3 = arith.constant 0 : index
    %c0_4 = arith.constant 0 : index
    %5 = vector.load %arg3[%c0_3, %c0_4] : memref<128x128xf32, #tpu.memory_space<vmem>>, vector<128x128xf32>
    %cst = arith.constant dense<0.000000e+00> : vector<512x128xf32>
    %6 = tpu.matmul %4, %5, %cst {dimension_numbers = #tpu.dot_dimension_numbers<[1], [0], [0], [1], [0, 0, 1, 1], [], []>} : vector<512x128xf32>, vector<128x128xf32>, vector<512x128xf32> -> vector<512x128xf32>
    %7 = arith.truncf %6 : vector<512x128xf32> to vector<512x128xbf16>
    %c0_5 = arith.constant 0 : index
    %c0_6 = arith.constant 0 : index
    %8 = vector.load %arg6[%c0_5, %c0_6] : memref<512x128xbf16, #tpu.memory_space<vmem>>, vector<512x128xbf16>
    tpu.vector_store %arg6[%c0_5, %c0_6], %7 {strides = array<i32>} : memref<512x128xbf16, #tpu.memory_space<vmem>>, vector<512x128xbf16>,
    %c0_7 = arith.constant 0 : index
    %c0_8 = arith.constant 0 : index
    %9 = vector.load %arg4[%c0_7, %c0_8] : memref<128x128xf32, #tpu.memory_space<vmem>>, vector<128x128xf32>
    %cst_9 = arith.constant dense<0.000000e+00> : vector<512x128xf32>
    %10 = tpu.matmul %1, %9, %cst_9 {dimension_numbers = #tpu.dot_dimension_numbers<[1], [0], [0], [1], [0, 0, 1, 1], [], []>} : vector<512x128xf32>, vector<128x128xf32>, vector<512x128xf32> -> vector<512x128xf32>
    %c0_10 = arith.constant 0 : index
    %c0_11 = arith.constant 0 : index
    %11 = vector.load %arg5[%c0_10, %c0_11] : memref<1x128xf32, #tpu.memory_space<vmem>>, vector<1x128xf32>
    %12 = vector.broadcast %11 : vector<1x128xf32> to vector<512x128xf32>
    %13 = arith.addf %10, %12 : vector<512x128xf32>
    %c0_12 = arith.constant 0 : index
    %c0_13 = arith.constant 0 : index
    %14 = vector.load %arg7[%c0_12, %c0_13] : memref<512x128xf32, #tpu.memory_space<vmem>>, vector<512x128xf32>
    tpu.vector_store %arg7[%c0_12, %c0_13], %13 {strides = array<i32>} : memref<512x128xf32, #tpu.memory_space<vmem>>, vector<512x128xf32>,
    return
  }
  func.func @transform_0(%arg0: i32) -> (i32, i32) {
    %c0_i32 = arith.constant 0 : i32
    %c0_i32_0 = arith.constant 0 : i32
    return %arg0, %c0_i32 : i32, i32
  }
  func.func @transform_1(%arg0: i32) -> (i32, i32) {
    %c0_i32 = arith.constant 0 : i32
    %c0_i32_0 = arith.constant 0 : i32
    return %arg0, %c0_i32 : i32, i32
  }
  func.func @transform_2(%arg0: i32) -> (i32, i32) {
    %c0_i32 = arith.constant 0 : i32
    %c0_i32_0 = arith.constant 0 : i32
    %c0_i32_1 = arith.constant 0 : i32
    return %c0_i32, %c0_i32_0 : i32, i32
  }
  func.func @transform_3(%arg0: i32) -> (i32, i32) {
    %c0_i32 = arith.constant 0 : i32
    %c0_i32_0 = arith.constant 0 : i32
    %c0_i32_1 = arith.constant 0 : i32
    return %c0_i32, %c0_i32_0 : i32, i32
  }
  func.func @transform_4(%arg0: i32) -> (i32, i32) {
    %c0_i32 = arith.constant 0 : i32
    %c0_i32_0 = arith.constant 0 : i32
    %c0_i32_1 = arith.constant 0 : i32
    return %c0_i32, %c0_i32_0 : i32, i32
  }
  func.func @transform_5(%arg0: i32) -> (i32, i32) {
    %c0_i32 = arith.constant 0 : i32
    %c0_i32_0 = arith.constant 0 : i32
    return %arg0, %c0_i32 : i32, i32
  }
  func.func @transform_6(%arg0: i32) -> (i32, i32) {
    %c0_i32 = arith.constant 0 : i32
    %c0_i32_0 = arith.constant 0 : i32
    return %arg0, %c0_i32 : i32, i32
  }
}

</mosaic_0001>

<bundles_post_ra>
// kernel: tpu_custom_call.1
= control target key start
LH: loop header
LB: loop body
LE: loop exit
PB: predicated region body
PF: predicated region fallthrough
CT: control target
= control target key end

     0   :  { %12 = vsyncpa [#allocation3], 0  ;;  %s4261_s0 = inlined_call_operand.vmem [shape: bf16[1024,128], index: 0, kind: input, shape index: {}]   ;;  %s4262_s1 = inlined_call_operand.vmem [shape: f32[1024,1], index: 1, kind: input, shape index: {}]   ;;  %s4263_s2 = inlined_call_operand.vmem [shape: f32[128,128], index: 2, kind: input, shape index: {}]   ;;  %s4264_s3 = inlined_call_operand.vmem [shape: f32[128,128], index: 3, kind: input, shape index: {}]   ;;  %s4265_s4 = inlined_call_operand.vmem [shape: f32[1,128], index: 4, kind: input, shape index: {}]   ;;  %s4266_s5 = inlined_call_operand.hbm [shape: bf16[1024,128], index: 5, kind: output, shape index: {0}]   ;;  %s4267_s6 = inlined_call_operand.hbm [shape: f32[1024,128], index: 6, kind: output, shape index: {1}]  }
   0x1   :  { %14 = vsyncpa [#allocation3 + $0x1], 0 }
   0x2   :  { %15 = vsyncpa [#allocation5], 0 }
   0x3   :  { %17 = vsyncpa [#allocation5 + $0x1], 0  ;;  %s3365_s21 = smov 0   ;;  %s3367_s22 = smov 0  }
   0x4   :  { %s3369_s23 = smov 0   ;;  %s3371_s24 = smov 0  }
   0x5 LB: > { %s3386_s25 = sadd.s32 4294967295, %s3321_s24   ;;  %s2197_s26 = sadd.s32 4294967294, %s3321_s24   ;;  %s3321_s24 = sphi %s3371_s24, %s4319_s24   ;;  %s3317_s23 = sphi %s3369_s23, %s4318_s23   ;;  %s3313_s22 = sphi %s3367_s22, %s4317_s22   ;;  %s3309_s21 = sphi %s3365_s21, %s4316_s21  }
   0x6   : > { %s3390_s27 = sadd.s32 1, %s3321_s24   ;;  %s145_s28 = sadd.s32 1, %s3317_s23 }
   0x7   : > { %s142_s29 = ssub.s32 %s3321_s24, %s3390_s27  ;;  %p155_p0 = scmp.ne.s32.totalorder %s3317_s23, %s3313_s22 }
   0x8   : > { %p143_p1 = scmp.eq.s32.totalorder %s142_s29, 0  ;;  %p156_p2 = scmp.eq.s32.totalorder %s3386_s25, 1 }
   0x9   : > { %p161_p3 = scmp.ne.s32.totalorder %s3313_s22, %s3309_s21  ;;  %p162_p4 = scmp.eq.s32.totalorder %s2197_s26, 1 }
   0xa   : > { %s3401_s30 = scalar_select %p143_p1, %s3317_s23, %s145_s28  }
   0xb   : > { %p3403_p5 = por %p156_p2, %p155_p0  ;;  %p3407_p6 = por %p162_p4, %p161_p3 }
   0xc   : > { %p2200_p7 = scmp.ge.s32.totalorder %s3321_s24, 1  ;;  %p233_p8 = scmp.lt.s32.totalorder %s3321_s24, 3 }
   0xe   : > { %p234_p9 = pnand %p2200_p7, %p233_p8 }
   0xf   : > { %s2203_s9 = sshll.u32 (!%p234_p9), %s3386_s25, 6  ;;  %v1584_v0 = vld [vmem:[%s4264_s3] sm:$0xff] (!%p234_p9)  ;;  %v1585_v1 = vld [vmem:[%s4264_s3 + $0x8] sm:$0xff] (!%p234_p9)  ;;  %v3323_v3 = vmov (!%p234_p9), 0   ;;  %v1586_v6 = vld [vmem:[%s4264_s3 + $0x10] sm:$0xff] (!%p234_p9)  ;;  %s3324_s12 = smov (!%p234_p9), [#allocation4]  }
  0x10   : > { %237 = sbr.rel (%p234_p9) target bundleno = 515 (0x203), region = 40  ;;  %v863_v2 = vld [vmem:[%s4263_s2] sm:$0xff] (!%p234_p9)  ;;  %3226 = vset.pattern.permute.xlu1 (!%p234_p9), %v3323_v3  ;;  %3225 = vset.pattern.permute.xlu0 (!%p234_p9), %v3323_v3  ;;  %p274_p10 = scmp.lt.s32.totalorder (!%p234_p9), %s2203_s9, 127  ;;  %v3144_v4 = vpack.c.bf16 (!%p234_p9), %v1585_v1, %v1584_v0  ;;  %v864_v5 = vld [vmem:[%s4263_s2 + $0x8] sm:$0xff] (!%p234_p9)  ;;  %v1587_v7 = vld [vmem:[%s4264_s3 + $0x18] sm:$0xff] (!%p234_p9) }
  0x11   : > { %v3112_v8 = vpack.c.bf16 (!%p234_p9), %v864_v5, %v863_v2  ;;  %v3148_v9 = vpack.c.bf16 (!%p234_p9), %v1587_v7, %v1586_v6  ;;  %v865_v10 = vld [vmem:[%s4263_s2 + $0x10] sm:$0xff] (!%p234_p9)  ;;  %v866_v11 = vld [vmem:[%s4263_s2 + $0x18] sm:$0xff] (!%p234_p9)  ;;  %v1588_v12 = vld [vmem:[%s4264_s3 + $0x20] sm:$0xff] (!%p234_p9) }
  0x12   : > { %3145 = vmatprep.subr.bf16.mxu1 (!%p234_p9), %v3144_v4  ;;  %v3116_v13 = vpack.c.bf16 (!%p234_p9), %v866_v11, %v865_v10  ;;  %v1589_v14 = vld [vmem:[%s4264_s3 + $0x28] sm:$0xff] (!%p234_p9)  ;;  %v867_v15 = vld [vmem:[%s4263_s2 + $0x20] sm:$0xff] (!%p234_p9)  ;;  %v1590_v19 = vld [vmem:[%s4264_s3 + $0x30] sm:$0xff] (!%p234_p9) }
  0x13   : > { %v868_v16 = vld [vmem:[%s4263_s2 + $0x28] sm:$0xff] (!%p234_p9)  ;;  %3113 = vmatprep.subr.bf16.mxu0 (!%p234_p9), %v3112_v8  ;;  %3147 = vmatpush3.bf16.msra.mxu1 (!%p234_p9), %v3144_v4  ;;  %v3152_v17 = vpack.c.bf16 (!%p234_p9), %v1589_v14, %v1588_v12  ;;  %v1591_v20 = vld [vmem:[%s4264_s3 + $0x38] sm:$0xff] (!%p234_p9)  ;;  %v869_v21 = vld [vmem:[%s4263_s2 + $0x30] sm:$0xff] (!%p234_p9) }
  0x14   : > { %3115 = vmatpush3.bf16.msra.mxu0 (!%p234_p9), %v3112_v8  ;;  %3149 = vmatprep.subr.bf16.mxu1 (!%p234_p9), %v3148_v9  ;;  %v3120_v18 = vpack.c.bf16 (!%p234_p9), %v868_v16, %v867_v15  ;;  %v870_v24 = vld [vmem:[%s4263_s2 + $0x38] sm:$0xff] (!%p234_p9)  ;;  %v3156_v27 = vpack.c.bf16 (!%p234_p9), %v1591_v20, %v1590_v19  ;;  %v1592_v29 = vld [vmem:[%s4264_s3 + $0x40] sm:$0xff] (!%p234_p9)  ;;  %v1593_v30 = vld [vmem:[%s4264_s3 + $0x48] sm:$0xff] (!%p234_p9) }
  0x15   : > { %3117 = vmatprep.subr.bf16.mxu0 (!%p234_p9), %v3116_v13  ;;  %v3124_v28 = vpack.c.bf16 (!%p234_p9), %v870_v24, %v869_v21  ;;  %v871_v31 = vld [vmem:[%s4263_s2 + $0x40] sm:$0xff] (!%p234_p9)  ;;  %v872_v32 = vld [vmem:[%s4263_s2 + $0x48] sm:$0xff] (!%p234_p9)  ;;  %v3160_v35 = vpack.c.bf16 (!%p234_p9), %v1593_v30, %v1592_v29  ;;  %v1594_v43 = vld [vmem:[%s4264_s3 + $0x50] sm:$0xff] (!%p234_p9) }
  0x16   : > { %v3128_v36 = vpack.c.bf16 (!%p234_p9), %v872_v32, %v871_v31  ;;  %v1595_v44 = vld [vmem:[%s4264_s3 + $0x58] sm:$0xff] (!%p234_p9)  ;;  %v873_v47 = vld [vmem:[%s4263_s2 + $0x50] sm:$0xff] (!%p234_p9)  ;;  %v1596_v51 = vld [vmem:[%s4264_s3 + $0x60] sm:$0xff] (!%p234_p9) }
  0x17   : > { %s4321_s9 = smov (!%p274_p10, %s2203_s9), 127  ;;  %3151 = vmatpush3.bf16.msra.mxu1 %v3148_v9  ;;  %v3164_v46 = vpack.c.bf16 %v1595_v44, %v1594_v43  ;;  %v874_v48 = vld [vmem:[%s4263_s2 + $0x58] sm:$0xff]  ;;  %v1597_v52 = vld [vmem:[%s4264_s3 + $0x68] sm:$0xff]  ;;  %v875_v54 = vld [vmem:[%s4263_s2 + $0x60] sm:$0xff] }
  0x18   : > { %s2206_s20 = sshll.u32 %s4321_s9, 3  ;;  %3119 = vmatpush3.bf16.msra.mxu0 %v3116_v13  ;;  %3153 = vmatprep.subr.bf16.mxu1 %v3152_v17  ;;  %s2204_s15 = sshll.u32 %s4321_s9, 2  ;;  %v3132_v50 = vpack.c.bf16 %v874_v48, %v873_v47  ;;  %v3168_v53 = vpack.c.bf16 %v1597_v52, %v1596_v51  ;;  %v876_v55 = vld [vmem:[%s4263_s2 + $0x68] sm:$0xff]  ;;  %v1598_v57 = vld [vmem:[%s4264_s3 + $0x70] sm:$0xff]  ;;  %v1599_v58 = vld [vmem:[%s4264_s3 + $0x78] sm:$0xff] }
  0x19   : > { %s3456_s29 = scalar_lea.vmem %s4262_s1, %s2206_s20  ;;  %3121 = vmatprep.subr.bf16.mxu0 %v3120_v18  ;;  %s3518_s14 = scalar_lea.vmem %s4261_s0, %s2204_s15  ;;  %v3136_v56 = vpack.c.bf16 %v876_v55, %v875_v54  ;;  %v877_v59 = vld [vmem:[%s4263_s2 + $0x70] sm:$0xff]  ;;  %v878_v60 = vld [vmem:[%s4263_s2 + $0x78] sm:$0xff]  ;;  %v3172_v0 = vpack.c.bf16 %v1599_v58, %v1598_v57 }
  0x1a   : > { %v417_v22 = vld [vmem:[%s3456_s29 + $0x10] sm:$0xff]  ;;  %v415_v23 = vld [vmem:[%s3456_s29] sm:$0xff]  ;;  %v418_v25 = vld [vmem:[%s3456_s29 + $0x18] sm:$0xff]  ;;  %v3140_v2 = vpack.c.bf16 %v878_v60, %v877_v59  ;;  %s2345_s20 = sshll.u32 %s3386_s25, 13 }
  0x1b   : > { %491 = vperm.xlu1 %3226, %v417_v22   ;;  %481 = vperm.xlu0 %3225, %v415_v23   ;;  %v416_v26 = vld [vmem:[%s3456_s29 + $0x8] sm:$0xff]  ;;  %v419_v34 = vld [vmem:[%s3456_s29 + $0x20] sm:$0xff]  ;;  %v422_v37 = vld [vmem:[%s3456_s29 + $0x38] sm:$0xff]  ;;  %s4154_s9 = scalar_lea.hbm %s4267_s6, %s2345_s20 }
  0x1c   : > { %v420_v33 = vld [vmem:[%s3456_s29 + $0x28] sm:$0xff]  ;;  %3155 = vmatpush3.bf16.msra.mxu1 %v3152_v17  ;;  %3123 = vmatpush3.bf16.msra.mxu0 %v3120_v18  ;;  %v421_v38 = vld [vmem:[%s3456_s29 + $0x30] sm:$0xff]  ;;  %v423_v40 = vld [vmem:[%s3456_s29 + $0x40] sm:$0xff] }
  0x1d   : > { %3157 = vmatprep.subr.bf16.mxu1 %v3156_v27  ;;  %3125 = vmatprep.subr.bf16.mxu0 %v3124_v28  ;;  %v424_v39 = vld [vmem:[%s3456_s29 + $0x48] sm:$0xff]  ;;  %v426_v41 = vld [vmem:[%s3456_s29 + $0x58] sm:$0xff]  ;;  %v425_v42 = vld [vmem:[%s3456_s29 + $0x50] sm:$0xff] }
  0x1e   : > { %v428_v45 = vld [vmem:[%s3456_s29 + $0x68] sm:$0xff]  ;;  %v427_v49 = vld [vmem:[%s3456_s29 + $0x60] sm:$0xff]  ;;  %v430_v62 = vld [vmem:[%s3456_s29 + $0x78] sm:$0xff] }
  0x1f   : > { %496 = vperm.xlu1 %3226, %v418_v25   ;;  %486 = vperm.xlu0 %3225, %v416_v26   ;;  %v3539_v61 = vld [vmem:[%s3518_s14] sm:$0xff]   ;;  %v429_v63 = vld [vmem:[%s3456_s29 + $0x70] sm:$0xff]  ;;  %v432_v3 = vld [vmem:[%s3456_s29 + $0x88] sm:$0xff] }
  0x20   : > { %3159 = vmatpush3.bf16.msra.mxu1 %v3156_v27  ;;  %3127 = vmatpush3.bf16.msra.mxu0 %v3124_v28  ;;  %v2348_v1 = vunpack.c.l.bf16 %v3539_v61  ;;  %v431_v4 = vld [vmem:[%s3456_s29 + $0x80] sm:$0xff]  ;;  %v3549_v5 = vld [vmem:[%s3518_s14 + $0x8] sm:$0xff]   ;;  %v2349_v6 = vunpack.c.h.bf16 %v3539_v61  ;;  %v434_v7 = vld [vmem:[%s3456_s29 + $0x98] sm:$0xff] }
  0x21   : > { %3161 = vmatprep.subr.bf16.mxu1 %v3160_v35  ;;  %3129 = vmatprep.subr.bf16.mxu0 %v3128_v36  ;;  %v433_v8 = vld [vmem:[%s3456_s29 + $0x90] sm:$0xff]  ;;  %v2352_v9 = vunpack.c.l.bf16 %v3549_v5  ;;  %v2353_v11 = vunpack.c.h.bf16 %v3549_v5  ;;  %v436_v12 = vld [vmem:[%s3456_s29 + $0xa8] sm:$0xff]  ;;  %v435_v13 = vld [vmem:[%s3456_s29 + $0xa0] sm:$0xff] }
  0x22   : > { %3016 = vmatprep.mubr.f32.mxu1 %v2348_v1  ;;  %v3558_v10 = vld [vmem:[%s3518_s14 + $0x10] sm:$0xff]   ;;  %v3569_v15 = vld [vmem:[%s3518_s14 + $0x18] sm:$0xff]   ;;  %v3580_v20 = vld [vmem:[%s3518_s14 + $0x20] sm:$0xff]  }
  0x23   : > { %506 = vperm.xlu1 %3226, %v420_v33   ;;  %501 = vperm.xlu0 %3225, %v419_v34   ;;  %v2356_v14 = vunpack.c.l.bf16 %v3558_v10  ;;  %v2357_v16 = vunpack.c.h.bf16 %v3558_v10  ;;  %v438_v17 = vld [vmem:[%s3456_s29 + $0xb8] sm:$0xff]  ;;  %v437_v18 = vld [vmem:[%s3456_s29 + $0xb0] sm:$0xff]  ;;  %v2360_v19 = vunpack.c.l.bf16 %v3569_v15  ;;  %v2361_v21 = vunpack.c.h.bf16 %v3569_v15  ;;  %v440_v22 = vld [vmem:[%s3456_s29 + $0xc8] sm:$0xff] }
  0x24   : > { %3163 = vmatpush3.bf16.msra.mxu1 %v3160_v35  ;;  %3131 = vmatpush3.bf16.msra.mxu0 %v3128_v36  ;;  %v439_v23 = vld [vmem:[%s3456_s29 + $0xc0] sm:$0xff]  ;;  %v2364_v24 = vunpack.c.l.bf16 %v3580_v20  ;;  %v3591_v25 = vld [vmem:[%s3518_s14 + $0x28] sm:$0xff]   ;;  %v2365_v26 = vunpack.c.h.bf16 %v3580_v20  ;;  %v442_v27 = vld [vmem:[%s3456_s29 + $0xd8] sm:$0xff] }
  0x25   : > { %3165 = vmatprep.subr.bf16.mxu1 %v3164_v46  ;;  %3133 = vmatprep.subr.bf16.mxu0 %v3132_v50  ;;  %v441_v28 = vld [vmem:[%s3456_s29 + $0xd0] sm:$0xff]  ;;  %v2368_v29 = vunpack.c.l.bf16 %v3591_v25  ;;  %v2369_v31 = vunpack.c.h.bf16 %v3591_v25  ;;  %v444_v32 = vld [vmem:[%s3456_s29 + $0xe8] sm:$0xff]  ;;  %v443_v33 = vld [vmem:[%s3456_s29 + $0xe0] sm:$0xff] }
  0x26   : > { %v3602_v30 = vld [vmem:[%s3518_s14 + $0x30] sm:$0xff]   ;;  %v3613_v35 = vld [vmem:[%s3518_s14 + $0x38] sm:$0xff]   ;;  %v447_v43 = vld [vmem:[%s3456_s29 + $0x100] sm:$0xff] }
  0x27   : > { %516 = vperm.xlu1 %3226, %v422_v37   ;;  %511 = vperm.xlu0 %3225, %v421_v38   ;;  %v2372_v34 = vunpack.c.l.bf16 %v3602_v30  ;;  %v2373_v36 = vunpack.c.h.bf16 %v3602_v30  ;;  %v446_v37 = vld [vmem:[%s3456_s29 + $0xf8] sm:$0xff]  ;;  %v445_v38 = vld [vmem:[%s3456_s29 + $0xf0] sm:$0xff]  ;;  %v452_v52 = vld [vmem:[%s3456_s29 + $0x128] sm:$0xff] }
  0x28   : > { %3167 = vmatpush3.bf16.msra.mxu1 %v3164_v46  ;;  %3135 = vmatpush3.bf16.msra.mxu0 %v3132_v50  ;;  %v450_v47 = vld [vmem:[%s3456_s29 + $0x118] sm:$0xff]  ;;  %v449_v48 = vld [vmem:[%s3456_s29 + $0x110] sm:$0xff]  ;;  %v3668_v60 = vld [vmem:[%s3518_s14 + $0x60] sm:$0xff]  }
  0x29   : > { %3169 = vmatprep.subr.bf16.mxu1 %v3168_v53  ;;  %3137 = vmatprep.subr.bf16.mxu0 %v3136_v56  ;;  %v3646_v50 = vld [vmem:[%s3518_s14 + $0x50] sm:$0xff]   ;;  %v3657_v55 = vld [vmem:[%s3518_s14 + $0x58] sm:$0xff]  }
  0x2a   : > { %v2388_v54 = vunpack.c.l.bf16 %v3646_v50  ;;  %v454_v57 = vld [vmem:[%s3456_s29 + $0x138] sm:$0xff]  ;;  %v453_v58 = vld [vmem:[%s3456_s29 + $0x130] sm:$0xff]  ;;  %v2392_v59 = vunpack.c.l.bf16 %v3657_v55 }
  0x2b   : > { %526 = vperm.xlu1 %3226, %v424_v39   ;;  %521 = vperm.xlu0 %3225, %v423_v40   ;;  %v2376_v39 = vunpack.c.l.bf16 %v3613_v35  ;;  %v3624_v40 = vld [vmem:[%s3518_s14 + $0x40] sm:$0xff]  }
  0x2c   : > { %3171 = vmatpush3.bf16.msra.mxu1 %v3168_v53  ;;  %3139 = vmatpush3.bf16.msra.mxu0 %v3136_v56  ;;  %v2380_v44 = vunpack.c.l.bf16 %v3624_v40  ;;  %v2381_v46 = vunpack.c.h.bf16 %v3624_v40  ;;  %v451_v53 = vld [vmem:[%s3456_s29 + $0x120] sm:$0xff]  ;;  %v2389_v56 = vunpack.c.h.bf16 %v3646_v50 }
  0x2d   : > { %3173 = vmatprep.subr.bf16.mxu1 %v3172_v0  ;;  %3141 = vmatprep.subr.bf16.mxu0 %v3140_v2 }
  0x2f   : > { %536 = vperm.xlu1 %3226, %v426_v41   ;;  %531 = vperm.xlu0 %3225, %v425_v42   ;;  %v2377_v41 = vunpack.c.h.bf16 %v3613_v35  ;;  %v448_v42 = vld [vmem:[%s3456_s29 + $0x108] sm:$0xff] }
  0x30   : > { %3175 = vmatpush3.bf16.msra.mxu1 %v3172_v0  ;;  %3143 = vmatpush3.bf16.msra.mxu0 %v3140_v2  ;;  %v455_v0 = vld [vmem:[%s3456_s29 + $0x140] sm:$0xff]  ;;  %v2396_v2 = vunpack.c.l.bf16 %v3668_v60 }
  0x33   : > { %546 = vperm.xlu1 %3226, %v428_v45   ;;  %541 = vperm.xlu0 %3225, %v427_v49   ;;  %v3635_v45 = vld [vmem:[%s3518_s14 + $0x48] sm:$0xff]  }
  0x34   : > { %3017 = vmatmul.mubr.f32.vlgmr.msra.gmra.mrb[0].mxu1 %v2349_v6  ;;  %v2384_v49 = vunpack.c.l.bf16 %v3635_v45  ;;  %v2385_v51 = vunpack.c.h.bf16 %v3635_v45 }
  0x35   : > { %3019 = vmatprep.mubr.f32.mxu1 %v2352_v9 }
  0x37   : > { %556 = vperm.xlu1 %3226, %v430_v62   ;;  %551 = vperm.xlu0 %3225, %v429_v63   ;;  %v2393_v62 = vunpack.c.h.bf16 %v3657_v55  ;;  %v456_v63 = vld [vmem:[%s3456_s29 + $0x148] sm:$0xff] }
  0x38   : > { %3020 = vmatmul.mubr.f32.gmra.mrb[2].mxu1 %v2353_v11 }
  0x39   : > { %3022 = vmatprep.mubr.f32.mxu1 %v2356_v14 }
  0x3b   : > { %566 = vperm.xlu1 %3226, %v432_v3   ;;  %561 = vperm.xlu0 %3225, %v431_v4   ;;  %v3679_v3 = vld [vmem:[%s3518_s14 + $0x68] sm:$0xff]   ;;  %v2397_v4 = vunpack.c.h.bf16 %v3668_v60 }
  0x3c   : > { %3023 = vmatmul.mubr.f32.gmra.mrb[4].mxu1 %v2357_v16 }
  0x3d   : > { %3025 = vmatprep.mubr.f32.mxu1 %v2360_v19 }
  0x3f   : > { %576 = vperm.xlu1 %3226, %v434_v7   ;;  %571 = vperm.xlu0 %3225, %v433_v8   ;;  %v458_v7 = vld [vmem:[%s3456_s29 + $0x158] sm:$0xff]  ;;  %v457_v8 = vld [vmem:[%s3456_s29 + $0x150] sm:$0xff] }
  0x40   : > { %3026 = vmatmul.mubr.f32.gmra.mrb[6].mxu1 %v2361_v21 }
  0x41   : > { %3028 = vmatprep.mubr.f32.mxu1 %v2364_v24 }
  0x43   : > { %586 = vperm.xlu1 %3226, %v436_v12   ;;  %581 = vperm.xlu0 %3225, %v435_v13   ;;  %v2400_v12 = vunpack.c.l.bf16 %v3679_v3  ;;  %v3690_v13 = vld [vmem:[%s3518_s14 + $0x70] sm:$0xff]  }
  0x44   : > { %3029 = vmatmul.mubr.f32.gmra.mrb[8].mxu1 %v2365_v26  ;;  %v4294_v60 = vunpack.c.h.bf16 %v3690_v13 }
  0x45   : > { %3031 = vmatprep.mubr.f32.mxu1 %v2368_v29 }
  0x47   : > { %596 = vperm.xlu1 %3226, %v438_v17   ;;  %591 = vperm.xlu0 %3225, %v437_v18   ;;  %v2401_v17 = vunpack.c.h.bf16 %v3679_v3  ;;  %v460_v18 = vld [vmem:[%s3456_s29 + $0x168] sm:$0xff] }
  0x48   : > { %3032 = vmatmul.mubr.f32.gmra.mrb[10].mxu1 %v2369_v31 }
  0x49   : > { %3034 = vmatprep.mubr.f32.mxu1 %v2372_v34 }
  0x4b   : > { %606 = vperm.xlu1 %3226, %v440_v22   ;;  %601 = vperm.xlu0 %3225, %v439_v23   ;;  %v459_v22 = vld [vmem:[%s3456_s29 + $0x160] sm:$0xff]  ;;  %v4287_v23 = vunpack.c.l.bf16 %v3690_v13 }
  0x4c   : > { %3035 = vmatmul.mubr.f32.gmra.mrb[12].mxu1 %v2373_v36 }
  0x4d   : > { %3037 = vmatprep.mubr.f32.mxu1 %v2376_v39 }
  0x4f   : > { %616 = vperm.xlu1 %3226, %v442_v27   ;;  %611 = vperm.xlu0 %3225, %v441_v28   ;;  %v3701_v27 = vld [vmem:[%s3518_s14 + $0x78] sm:$0xff]   ;;  %v4286_v28 = vunpack.c.h.bf16 %v3690_v13 }
  0x50   : > { %3038 = vmatmul.mubr.f32.gmra.mrb[14].mxu1 %v2377_v41  ;;  %v4296_v3 = vunpack.c.h.bf16 %v3701_v27 }
  0x51   : > { %3040 = vmatprep.mubr.f32.mxu1 %v2380_v44 }
  0x53   : > { %626 = vperm.xlu1 %3226, %v444_v32   ;;  %621 = vperm.xlu0 %3225, %v443_v33   ;;  %v462_v32 = vld [vmem:[%s3456_s29 + $0x178] sm:$0xff]  ;;  %v461_v33 = vld [vmem:[%s3456_s29 + $0x170] sm:$0xff] }
  0x54   : > { %3041 = vmatmul.mubr.f32.gmra.mrb[16].mxu1 %v2381_v46 }
  0x55   : > { %3043 = vmatprep.mubr.f32.mxu1 %v2384_v49 }
  0x57   : > { %636 = vperm.xlu1 %3226, %v446_v37   ;;  %631 = vperm.xlu0 %3225, %v445_v38   ;;  %v4282_v37 = vunpack.c.l.bf16 %v3701_v27  ;;  %v3712_v38 = vld [vmem:[%s3518_s14 + $0x80] sm:$0xff]  }
  0x58   : > { %3044 = vmatmul.mubr.f32.gmra.mrb[18].mxu1 %v2385_v51 }
  0x59   : > { %3046 = vmatprep.mubr.f32.mxu1 %v2388_v54 }
  0x5b   : > { %646 = vperm.xlu1 %3226, %v448_v42   ;;  %641 = vperm.xlu0 %3225, %v447_v43   ;;  %v4279_v42 = vunpack.c.h.bf16 %v3701_v27  ;;  %v464_v43 = vld [vmem:[%s3456_s29 + $0x188] sm:$0xff] }
  0x5c   : > { %3047 = vmatmul.mubr.f32.gmra.mrb[20].mxu1 %v2389_v56 }
  0x5d   : > { %3049 = vmatprep.mubr.f32.mxu1 %v2392_v59 }
  0x5f   : > { %656 = vperm.xlu1 %3226, %v450_v47   ;;  %651 = vperm.xlu0 %3225, %v449_v48   ;;  %v463_v47 = vld [vmem:[%s3456_s29 + $0x180] sm:$0xff]  ;;  %v4276_v48 = vunpack.c.l.bf16 %v3712_v38 }
  0x60   : > { %3050 = vmatmul.mubr.f32.gmra.mrb[22].mxu1 %v2393_v62 }
  0x61   : > { %3052 = vmatprep.mubr.f32.mxu1 %v2396_v2 }
  0x63   : > { %666 = vperm.xlu1 %3226, %v452_v52   ;;  %661 = vperm.xlu0 %3225, %v451_v53   ;;  %v3723_v52 = vld [vmem:[%s3518_s14 + $0x88] sm:$0xff]   ;;  %v4275_v53 = vunpack.c.h.bf16 %v3712_v38 }
  0x64   : > { %3053 = vmatmul.mubr.f32.gmra.mrb[24].mxu1 %v2397_v4 }
  0x65   : > { %3055 = vmatprep.mubr.f32.mxu1 %v2400_v12 }
  0x67   : > { %676 = vperm.xlu1 %3226, %v454_v57   ;;  %671 = vperm.xlu0 %3225, %v453_v58   ;;  %v466_v57 = vld [vmem:[%s3456_s29 + $0x198] sm:$0xff]  ;;  %v465_v58 = vld [vmem:[%s3456_s29 + $0x190] sm:$0xff] }
  0x68   : > { %3056 = vmatmul.mubr.f32.gmra.mrb[26].mxu1 %v2401_v17 }
  0x69   : > { %3058 = vmatprep.mubr.f32.mxu1 %v4287_v23 }
  0x6b   : > { %686 = vperm.xlu1 %3226, %v456_v63   ;;  %681 = vperm.xlu0 %3225, %v455_v0   ;;  %v4272_v63 = vunpack.c.l.bf16 %v3723_v52  ;;  %v3734_v0 = vld [vmem:[%s3518_s14 + $0x90] sm:$0xff]  }
  0x6c   : > { %3059 = vmatmul.mubr.f32.gmra.mrb[28].mxu1 %v4286_v28 }
  0x6d   : > { %3061 = vmatprep.mubr.f32.mxu1 %v4282_v37 }
  0x6f   : > { %696 = vperm.xlu1 %3226, %v458_v7   ;;  %691 = vperm.xlu0 %3225, %v457_v8   ;;  %v4269_v7 = vunpack.c.h.bf16 %v3723_v52  ;;  %v468_v8 = vld [vmem:[%s3456_s29 + $0x1a8] sm:$0xff] }
  0x70   : > { %3062 = vmatmul.mubr.f32.gmra.mrb[30].mxu1 %v4279_v42  ;;  %v3800_v42 = vld [vmem:[%s3518_s14 + $0xc0] sm:$0xff]  }
  0x71   : > { %3064 = vmatprep.mubr.f32.mxu1 %v4276_v48  ;;  %v3789_v48 = vld [vmem:[%s3518_s14 + $0xb8] sm:$0xff]  }
  0x73   : > { %706 = vperm.xlu1 %3226, %v460_v18   ;;  %701 = vperm.xlu0 %3225, %v459_v22   ;;  %v467_v18 = vld [vmem:[%s3456_s29 + $0x1a0] sm:$0xff]  ;;  %v4268_v22 = vunpack.c.l.bf16 %v3734_v0 }
  0x74   : > { %3065 = vmatmul.mubr.f32.gmra.mrb[32].mxu1 %v4275_v53 }
  0x75   : > { %3067 = vmatprep.mubr.f32.mxu1 %v4272_v63 }
  0x77   : > { %716 = vperm.xlu1 %3226, %v462_v32   ;;  %711 = vperm.xlu0 %3225, %v461_v33   ;;  %v3745_v32 = vld [vmem:[%s3518_s14 + $0x98] sm:$0xff]   ;;  %v4270_v33 = vunpack.c.h.bf16 %v3734_v0 }
  0x78   : > { %3068 = vmatmul.mubr.f32.gmra.mrb[34].mxu1 %v4269_v7 }
  0x79   : > { %3070 = vmatprep.mubr.f32.mxu1 %v4268_v22  ;;  %v471_v22 = vld [vmem:[%s3456_s29 + $0x1c0] sm:$0xff] }
  0x7b   : > { %726 = vperm.xlu1 %3226, %v464_v43   ;;  %721 = vperm.xlu0 %3225, %v463_v47   ;;  %v470_v43 = vld [vmem:[%s3456_s29 + $0x1b8] sm:$0xff]  ;;  %v469_v47 = vld [vmem:[%s3456_s29 + $0x1b0] sm:$0xff] }
  0x7c   : > { %3071 = vmatmul.mubr.f32.gmra.mrb[36].mxu1 %v4270_v33  ;;  %v3767_v33 = vld [vmem:[%s3518_s14 + $0xa8] sm:$0xff]  }
  0x7d   : > { %v4277_v63 = vunpack.c.l.bf16 %v3767_v33 }
  0x7f   : > { %736 = vperm.xlu1 %3226, %v466_v57   ;;  %731 = vperm.xlu0 %3225, %v465_v58   ;;  %v4271_v57 = vunpack.c.l.bf16 %v3745_v32  ;;  %v3756_v58 = vld [vmem:[%s3518_s14 + $0xa0] sm:$0xff]  }
  0x80   : > { %v4274_v7 = vunpack.c.l.bf16 %v3756_v58 }
  0x81   : > { %3073 = vmatprep.mubr.f32.mxu1 %v4271_v57  ;;  %v473_v57 = vld [vmem:[%s3456_s29 + $0x1d0] sm:$0xff] }
  0x83   : > { %746 = vperm.xlu1 %3226, %v468_v8   ;;  %741 = vperm.xlu0 %3225, %v467_v18   ;;  %v4273_v8 = vunpack.c.h.bf16 %v3745_v32  ;;  %v472_v18 = vld [vmem:[%s3456_s29 + $0x1c8] sm:$0xff] }
  0x85   : > { %3074 = vmatmul.mubr.f32.gmra.mrb[38].mxu1 %v4273_v8  ;;  %v3778_v8 = vld [vmem:[%s3518_s14 + $0xb0] sm:$0xff]  }
  0x86   : > { %3076 = vmatprep.mubr.f32.mxu1 %v4274_v7  ;;  %v475_v7 = vld [vmem:[%s3456_s29 + $0x1e0] sm:$0xff]  ;;  %v4280_v53 = vunpack.c.l.bf16 %v3778_v8 }
  0x87   : > { %756 = vperm.xlu1 %3226, %v470_v43   ;;  %751 = vperm.xlu0 %3225, %v469_v47   ;;  %v4278_v43 = vunpack.c.h.bf16 %v3756_v58  ;;  %v474_v47 = vld [vmem:[%s3456_s29 + $0x1d8] sm:$0xff] }
  0x89   : > { %3077 = vmatmul.mubr.f32.gmra.mrb[40].mxu1 %v4278_v43  ;;  %v4283_v43 = vunpack.c.l.bf16 %v3789_v48 }
  0x8a   : > { %3079 = vmatprep.mubr.f32.mxu1 %v4277_v63  ;;  %v477_v63 = vld [vmem:[%s3456_s29 + $0x1f0] sm:$0xff] }
  0x8b   : > { %766 = vperm.xlu1 %3226, %v472_v18   ;;  %761 = vperm.xlu0 %3225, %v471_v22   ;;  %v4281_v22 = vunpack.c.h.bf16 %v3767_v33  ;;  %v476_v18 = vld [vmem:[%s3456_s29 + $0x1e8] sm:$0xff] }
  0x8d   : > { %3080 = vmatmul.mubr.f32.gmra.mrb[42].mxu1 %v4281_v22 }
  0x8e   : > { %3082 = vmatprep.mubr.f32.mxu1 %v4280_v53  ;;  %v3809_v53 = vld [vmem:[%s3518_s14 + $0xc8] sm:$0xff]  }
  0x8f   : > { %776 = vperm.xlu1 %3226, %v474_v47   ;;  %771 = vperm.xlu0 %3225, %v473_v57   ;;  %v4285_v47 = vunpack.c.h.bf16 %v3778_v8  ;;  %v478_v57 = vld [vmem:[%s3456_s29 + $0x1f8] sm:$0xff]  ;;  %s3987_s29 = sand.u32 1, %s3313_s22  }
  0x90   : > { %s2202_s13 = sshll.u32 %s3987_s29, 9  ;;  %s2201_s18 = sshll.u32 %s3987_s29, 8 }
  0x91   : > { %3083 = vmatmul.mubr.f32.gmra.mrb[44].mxu1 %v4285_v47  ;;  %s4009_s17 = scalar_lea.vmem [#allocation4], %s2202_s13  ;;  %s4119_s19 = scalar_lea.vmem [#allocation2], %s2201_s18 }
  0x92   : > { %3085 = vmatprep.mubr.f32.mxu1 %v4283_v43  ;;  %s2091_s26 = sshll.u32 %s4009_s17, 4  ;;  %s2062_s10 = scalar_lea.sflag [#allocation5], %s3987_s29  ;;  %s4156_s26 = int_to_ptr.vmem [resolvable:$true] %s2091_s26 }
  0x93   : > { %786 = vperm.xlu1 %3226, %v476_v18   ;;  %781 = vperm.xlu0 %3225, %v475_v7   ;;  %v4284_v18 = vunpack.c.h.bf16 %v3789_v48  ;;  %v2444_v7 = vunpack.c.l.bf16 %v3800_v42  ;;  %s3227_s11 = scalar_lea.vmem %s4156_s26, 8192  ;;  %s3231_s13 = sshll.u32 %s3324_s12, 4  ;;  %s3232_s13 = int_to_ptr.vmem [resolvable:$false] %s3231_s13 }
  0x94   : > { %p3228_p11 = scmp.ne.s32.totalorder %s4156_s26, %s3227_s11  ;;  %p3234_p0 = scmp.lt.s32.totalorder %s4156_s26, %s3232_s13 }
  0x95   : > { %3086 = vmatmul.mubr.f32.gmra.mrb[46].mxu1 %v4284_v18  ;;  %v3820_v18 = vld [vmem:[%s3518_s14 + $0xd0] sm:$0xff]  }
  0x96   : > { %3088 = vmatprep.mubr.f32.mxu1 %v2444_v7  ;;  %p3229_p12 = pnand %p3228_p11, %p3403_p5 }
  0x97   : > { %796 = vperm.xlu1 %3226, %v478_v57   ;;  %791 = vperm.xlu0 %3225, %v477_v63   ;;  %v4288_v63 = vunpack.c.h.bf16 %v3800_v42  ;;  %v4290_v57 = vunpack.c.l.bf16 %v3809_v53 }
  0x98   : > { %p3230_p13 = pneg %p3229_p12 }
  0x99   : > { %3089 = vmatmul.mubr.f32.gmra.mrb[48].mxu1 %v4288_v63  ;;  %v3833_v63 = vld [vmem:[%s3518_s14 + $0xd8] sm:$0xff]  }
  0x9a   : > { %v492_v22 = vpop.permute.xlu1 %491  ;;  %v482_v37 = vpop.permute.xlu0 %481  ;;  %3091 = vmatprep.mubr.f32.mxu1 %v4290_v57 }
  0x9b   : > { %v799_v43 = vmul.f32 %v2348_v1, %v482_v37  ;;  %v801_v47 = vmul.f32 %v2352_v9, %v492_v22  ;;  %v4289_v37 = vunpack.c.h.bf16 %v3809_v53 }
  0x9d   : > { %2888 = vmatprep.mubr.f32.mxu0 %v799_v43  ;;  %v2452_v43 = vunpack.c.l.bf16 %v3820_v18  ;;  %3092 = vmatmul.mubr.f32.gmra.mrb[50].mxu1 %v4289_v37  ;;  %v3846_v37 = vld [vmem:[%s3518_s14 + $0xe0] sm:$0xff]  }
  0x9e   : > { %v497_v28 = vpop.permute.xlu1 %496  ;;  %v487_v23 = vpop.permute.xlu0 %486 }
  0x9f   : > { %v800_v1 = vmul.f32 %v2349_v6, %v487_v23  ;;  %3094 = vmatprep.mubr.f32.mxu1 %v2452_v43  ;;  %v802_v61 = vmul.f32 %v2353_v11, %v497_v28  ;;  %v2453_v23 = vunpack.c.h.bf16 %v3820_v18  ;;  %v2460_v28 = vunpack.c.l.bf16 %v3846_v37 }
  0xa1   : > { %2889 = vmatmul.mubr.f32.vlgmr.msra.gmra.mrb[0].mxu0 %v800_v1  ;;  %v2456_v1 = vunpack.c.l.bf16 %v3833_v63  ;;  %3095 = vmatmul.mubr.f32.gmra.mrb[52].mxu1 %v2453_v23 }
  0xa2   : > { %v507_v9 = vpop.permute.xlu1 %506  ;;  %v502_v22 = vpop.permute.xlu0 %501  ;;  %2891 = vmatprep.mubr.f32.mxu0 %v801_v47 }
  0xa3   : > { %v803_v6 = vmul.f32 %v2356_v14, %v502_v22  ;;  %3097 = vmatprep.mubr.f32.mxu1 %v2456_v1  ;;  %v804_v5 = vmul.f32 %v2357_v16, %v507_v9  ;;  %v2457_v14 = vunpack.c.h.bf16 %v3833_v63  ;;  %v3859_v22 = vld [vmem:[%s3518_s14 + $0xe8] sm:$0xff]   ;;  %v3872_v9 = vld [vmem:[%s3518_s14 + $0xf0] sm:$0xff]  }
  0xa5   : > { %2892 = vmatmul.mubr.f32.gmra.mrb[2].mxu0 %v802_v61  ;;  %3098 = vmatmul.mubr.f32.gmra.mrb[54].mxu1 %v2457_v14 }
  0xa6   : > { %v517_v47 = vpop.permute.xlu1 %516  ;;  %v512_v57 = vpop.permute.xlu0 %511  ;;  %2894 = vmatprep.mubr.f32.mxu0 %v803_v6  ;;  %3100 = vmatprep.mubr.f32.mxu1 %v2460_v28 }
  0xa7   : > { %v805_v11 = vmul.f32 %v2360_v19, %v512_v57  ;;  %v806_v10 = vmul.f32 %v2361_v21, %v517_v47  ;;  %v2461_v19 = vunpack.c.h.bf16 %v3846_v37  ;;  %v2464_v57 = vunpack.c.l.bf16 %v3859_v22 }
  0xa8   : > { %v2468_v47 = vunpack.c.l.bf16 %v3872_v9 }
  0xa9   : > { %2895 = vmatmul.mubr.f32.gmra.mrb[4].mxu0 %v804_v5  ;;  %3101 = vmatmul.mubr.f32.gmra.mrb[56].mxu1 %v2461_v19 }
  0xaa   : > { %v527_v61 = vpop.permute.xlu1 %526  ;;  %v522_v6 = vpop.permute.xlu0 %521  ;;  %2897 = vmatprep.mubr.f32.mxu0 %v805_v11  ;;  %3103 = vmatprep.mubr.f32.mxu1 %v2464_v57 }
  0xab   : > { %v807_v16 = vmul.f32 %v2364_v24, %v522_v6  ;;  %v808_v15 = vmul.f32 %v2365_v26, %v527_v61  ;;  %v2465_v24 = vunpack.c.h.bf16 %v3859_v22  ;;  %v3885_v6 = vld [vmem:[%s3518_s14 + $0xf8] sm:$0xff]   ;;  %s3233_s14 = scalar_lea.vmem %s3232_s13, 16384 }
  0xac   : > { %v2472_v61 = vunpack.c.l.bf16 %v3885_v6  ;;  %p3235_p1 = scmp.lt.s32.totalorder %s3233_s14, %s3227_s11 }
  0xad   : > { %2898 = vmatmul.mubr.f32.gmra.mrb[6].mxu0 %v806_v10  ;;  %3104 = vmatmul.mubr.f32.gmra.mrb[58].mxu1 %v2465_v24 }
  0xae   : > { %v537_v5 = vpop.permute.xlu1 %536  ;;  %v532_v11 = vpop.permute.xlu0 %531  ;;  %2900 = vmatprep.mubr.f32.mxu0 %v807_v16  ;;  %3106 = vmatprep.mubr.f32.mxu1 %v2468_v47  ;;  %p3236_p2 = por %p3235_p1, %p3234_p0 }
  0xaf   : > { %v809_v21 = vmul.f32 %v2368_v29, %v532_v11  ;;  %v810_v20 = vmul.f32 %v2369_v31, %v537_v5  ;;  %v2469_v29 = vunpack.c.h.bf16 %v3872_v9 }
  0xb0   : > { %p3237_p3 = pnand %p3236_p2, %p3230_p13 }
  0xb1   : > { %2901 = vmatmul.mubr.f32.gmra.mrb[8].mxu0 %v808_v15  ;;  %3107 = vmatmul.mubr.f32.gmra.mrb[60].mxu1 %v2469_v29 }
  0xb2   : > { %v547_v10 = vpop.permute.xlu1 %546  ;;  %v542_v16 = vpop.permute.xlu0 %541  ;;  %2903 = vmatprep.mubr.f32.mxu0 %v809_v21  ;;  %3109 = vmatprep.mubr.f32.mxu1 %v2472_v61 }
  0xb3   : > { %v811_v26 = vmul.f32 %v2372_v34, %v542_v16  ;;  %v812_v25 = vmul.f32 %v2373_v36, %v547_v10  ;;  %v2473_v34 = vunpack.c.h.bf16 %v3885_v6 }
  0xb5   : > { %2904 = vmatmul.mubr.f32.gmra.mrb[10].mxu0 %v810_v20  ;;  %3110 = vmatmul.mubr.f32.gmra.mrb[62].mxu1 %v2473_v34 }
  0xb6   : > { %v557_v11 = vpop.permute.xlu1 %556  ;;  %v552_v15 = vpop.permute.xlu0 %551  ;;  %2906 = vmatprep.mubr.f32.mxu0 %v811_v26 }
  0xb7   : > { %v813_v31 = vmul.f32 %v2376_v39, %v552_v15  ;;  %v814_v16 = vmul.f32 %v2377_v41, %v557_v11 }
  0xb9   : > { %2907 = vmatmul.mubr.f32.gmra.mrb[12].mxu0 %v812_v25 }
  0xba   : > { %v567_v5 = vpop.permute.xlu1 %566  ;;  %v562_v21 = vpop.permute.xlu0 %561  ;;  %2909 = vmatprep.mubr.f32.mxu0 %v813_v31 }
  0xbb   : > { %v815_v20 = vmul.f32 %v2380_v44, %v562_v21  ;;  %v816_v39 = vmul.f32 %v2381_v46, %v567_v5 }
  0xbd   : > { %2910 = vmatmul.mubr.f32.gmra.mrb[14].mxu0 %v814_v16 }
  0xbe   : > { %v577_v30 = vpop.permute.xlu1 %576  ;;  %v572_v36 = vpop.permute.xlu0 %571  ;;  %2912 = vmatprep.mubr.f32.mxu0 %v815_v20  ;;  %v4295_v20 = vunpack.c.l.bf16 %v3701_v27  ;;  %v4300_v27 = vunpack.c.h.bf16 %v3723_v52 }
  0xbf   : > { %v817_v10 = vmul.f32 %v2384_v49, %v572_v36  ;;  %v818_v35 = vmul.f32 %v2385_v51, %v577_v30 }
  0xc1   : > { %2913 = vmatmul.mubr.f32.gmra.mrb[16].mxu0 %v816_v39  ;;  %v4297_v39 = vunpack.c.l.bf16 %v3712_v38 }
  0xc2   : > { %v587_v26 = vpop.permute.xlu1 %586  ;;  %v582_v15 = vpop.permute.xlu0 %581  ;;  %2915 = vmatprep.mubr.f32.mxu0 %v817_v10 }
  0xc3   : > { %v819_v41 = vmul.f32 %v2388_v54, %v582_v15  ;;  %v820_v40 = vmul.f32 %v2389_v56, %v587_v26 }
  0xc5   : > { %2916 = vmatmul.mubr.f32.gmra.mrb[18].mxu0 %v818_v35 }
  0xc6   : > { %v597_v44 = vpop.permute.xlu1 %596  ;;  %v592_v11 = vpop.permute.xlu0 %591  ;;  %2918 = vmatprep.mubr.f32.mxu0 %v819_v41  ;;  %v4299_v41 = vunpack.c.l.bf16 %v3723_v52  ;;  %v4304_v52 = vunpack.c.h.bf16 %v3745_v32 }
  0xc7   : > { %v821_v46 = vmul.f32 %v2392_v59, %v592_v11  ;;  %v822_v45 = vmul.f32 %v2393_v62, %v597_v44  ;;  %v4293_v62 = vunpack.c.l.bf16 %v3690_v13  ;;  %v4298_v13 = vunpack.c.h.bf16 %v3712_v38 }
  0xc8   : > { %v4302_v38 = vunpack.c.h.bf16 %v3734_v0 }
  0xc9   : > { %2919 = vmatmul.mubr.f32.gmra.mrb[20].mxu0 %v820_v40 }
  0xca   : > { %v607_v49 = vpop.permute.xlu1 %606  ;;  %v602_v25 = vpop.permute.xlu0 %601  ;;  %2921 = vmatprep.mubr.f32.mxu0 %v821_v46 }
  0xcb   : > { %v823_v51 = vmul.f32 %v2396_v2, %v602_v25  ;;  %v824_v50 = vmul.f32 %v2397_v4, %v607_v49  ;;  %v4301_v49 = vunpack.c.l.bf16 %v3734_v0  ;;  %v4306_v0 = vunpack.c.h.bf16 %v3756_v58 }
  0xcd   : > { %2922 = vmatmul.mubr.f32.gmra.mrb[22].mxu0 %v822_v45 }
  0xce   : > { %v617_v54 = vpop.permute.xlu1 %616  ;;  %v612_v31 = vpop.permute.xlu0 %611  ;;  %2924 = vmatprep.mubr.f32.mxu0 %v823_v51 }
  0xcf   : > { %v825_v56 = vmul.f32 %v2400_v12, %v612_v31  ;;  %v826_v55 = vmul.f32 %v2401_v17, %v617_v54  ;;  %v4303_v31 = vunpack.c.l.bf16 %v3745_v32  ;;  %v4308_v32 = vunpack.c.h.bf16 %v3767_v33 }
  0xd1   : > { %2925 = vmatmul.mubr.f32.gmra.mrb[24].mxu0 %v824_v50 }
  0xd2   : > { %v627_v59 = vpop.permute.xlu1 %626  ;;  %v622_v5 = vpop.permute.xlu0 %621  ;;  %2927 = vmatprep.mubr.f32.mxu0 %v825_v56 }
  0xd3   : > { %v827_v2 = vmul.f32 %v4293_v62, %v622_v5  ;;  %v828_v4 = vmul.f32 %v4294_v60, %v627_v59  ;;  %v4307_v60 = vunpack.c.l.bf16 %v3767_v33  ;;  %v4312_v33 = vunpack.c.h.bf16 %v3789_v48 }
  0xd5   : > { %2928 = vmatmul.mubr.f32.gmra.mrb[26].mxu0 %v826_v55  ;;  %v4305_v55 = vunpack.c.l.bf16 %v3756_v58  ;;  %v4310_v58 = vunpack.c.h.bf16 %v3778_v8 }
  0xd6   : > { %v637_v21 = vpop.permute.xlu1 %636  ;;  %v632_v16 = vpop.permute.xlu0 %631  ;;  %2930 = vmatprep.mubr.f32.mxu0 %v827_v2 }
  0xd7   : > { %v829_v12 = vmul.f32 %v4295_v20, %v632_v16  ;;  %v830_v17 = vmul.f32 %v4296_v3, %v637_v21 }
  0xd9   : > { %2931 = vmatmul.mubr.f32.gmra.mrb[28].mxu0 %v828_v4 }
  0xda   : > { %v647_v30 = vpop.permute.xlu1 %646  ;;  %v642_v36 = vpop.permute.xlu0 %641  ;;  %2933 = vmatprep.mubr.f32.mxu0 %v829_v12 }
  0xdb   : > { %v831_v10 = vmul.f32 %v4297_v39, %v642_v36  ;;  %v832_v35 = vmul.f32 %v4298_v13, %v647_v30  ;;  %v4309_v36 = vunpack.c.l.bf16 %v3778_v8  ;;  %v4313_v8 = vunpack.c.h.bf16 %v3800_v42 }
  0xdd   : > { %2934 = vmatmul.mubr.f32.gmra.mrb[30].mxu0 %v830_v17 }
  0xde   : > { %v657_v26 = vpop.permute.xlu1 %656  ;;  %v652_v15 = vpop.permute.xlu0 %651  ;;  %2936 = vmatprep.mubr.f32.mxu0 %v831_v10 }
  0xdf   : > { %v833_v44 = vmul.f32 %v4299_v41, %v652_v15  ;;  %v834_v46 = vmul.f32 %v4300_v27, %v657_v26  ;;  %v4311_v26 = vunpack.c.l.bf16 %v3789_v48  ;;  %v4315_v48 = vunpack.c.h.bf16 %v3809_v53 }
  0xe1   : > { %2937 = vmatmul.mubr.f32.gmra.mrb[32].mxu0 %v832_v35 }
  0xe2   : > { %v667_v11 = vpop.permute.xlu1 %666  ;;  %v662_v40 = vpop.permute.xlu0 %661  ;;  %2939 = vmatprep.mubr.f32.mxu0 %v833_v44 }
  0xe3   : > { %v835_v25 = vmul.f32 %v4301_v49, %v662_v40  ;;  %v836_v54 = vmul.f32 %v4302_v38, %v667_v11 }
  0xe5   : > { %2940 = vmatmul.mubr.f32.gmra.mrb[34].mxu0 %v834_v46  ;;  %v4314_v46 = vunpack.c.l.bf16 %v3809_v53 }
  0xe6   : > { %v677_v45 = vpop.permute.xlu1 %676  ;;  %v672_v51 = vpop.permute.xlu0 %671  ;;  %2942 = vmatprep.mubr.f32.mxu0 %v835_v25 }
  0xe7   : > { %v837_v50 = vmul.f32 %v4303_v31, %v672_v51  ;;  %v838_v5 = vmul.f32 %v4304_v52, %v677_v45 }
  0xe9   : > { %2943 = vmatmul.mubr.f32.gmra.mrb[36].mxu0 %v836_v54 }
  0xea   : > { %v687_v56 = vpop.permute.xlu1 %686  ;;  %v682_v59 = vpop.permute.xlu0 %681  ;;  %2945 = vmatprep.mubr.f32.mxu0 %v837_v50 }
  0xeb   : > { %v839_v62 = vmul.f32 %v4305_v55, %v682_v59  ;;  %v840_v16 = vmul.f32 %v4306_v0, %v687_v56 }
  0xed   : > { %2946 = vmatmul.mubr.f32.gmra.mrb[38].mxu0 %v838_v5 }
  0xee   : > { %v697_v2 = vpop.permute.xlu1 %696  ;;  %v692_v21 = vpop.permute.xlu0 %691  ;;  %2948 = vmatprep.mubr.f32.mxu0 %v839_v62 }
  0xef   : > { %v841_v4 = vmul.f32 %v4307_v60, %v692_v21  ;;  %v842_v30 = vmul.f32 %v4308_v32, %v697_v2 }
  0xf1   : > { %2949 = vmatmul.mubr.f32.gmra.mrb[40].mxu0 %v840_v16 }
  0xf2   : > { %v707_v20 = vpop.permute.xlu1 %706  ;;  %v702_v12 = vpop.permute.xlu0 %701  ;;  %2951 = vmatprep.mubr.f32.mxu0 %v841_v4 }
  0xf3   : > { %v843_v3 = vmul.f32 %v4309_v36, %v702_v12  ;;  %v844_v10 = vmul.f32 %v4310_v58, %v707_v20 }
  0xf5   : > { %2952 = vmatmul.mubr.f32.gmra.mrb[42].mxu0 %v842_v30 }
  0xf6   : > { %v717_v17 = vpop.permute.xlu1 %716  ;;  %v712_v39 = vpop.permute.xlu0 %711  ;;  %2954 = vmatprep.mubr.f32.mxu0 %v843_v3 }
  0xf7   : > { %v845_v15 = vmul.f32 %v4311_v26, %v712_v39  ;;  %v846_v41 = vmul.f32 %v4312_v33, %v717_v17 }
  0xf9   : > { %2955 = vmatmul.mubr.f32.gmra.mrb[44].mxu0 %v844_v10 }
  0xfa   : > { %v727_v13 = vpop.permute.xlu1 %726  ;;  %v722_v35 = vpop.permute.xlu0 %721  ;;  %2957 = vmatprep.mubr.f32.mxu0 %v845_v15 }
  0xfb   : > { %v847_v44 = vmul.f32 %v2444_v7, %v722_v35  ;;  %v848_v27 = vmul.f32 %v4313_v8, %v727_v13 }
  0xfd   : > { %2958 = vmatmul.mubr.f32.gmra.mrb[46].mxu0 %v846_v41 }
  0xfe   : > { %v737_v11 = vpop.permute.xlu1 %736  ;;  %v732_v40 = vpop.permute.xlu0 %731  ;;  %2960 = vmatprep.mubr.f32.mxu0 %v847_v44 }
  0xff   : > { %v849_v49 = vmul.f32 %v4314_v46, %v732_v40  ;;  %v850_v51 = vmul.f32 %v4315_v48, %v737_v11 }
 0x101   : > { %2961 = vmatmul.mubr.f32.gmra.mrb[48].mxu0 %v848_v27 }
 0x102   : > { %v747_v25 = vpop.permute.xlu1 %746  ;;  %v742_v45 = vpop.permute.xlu0 %741  ;;  %2963 = vmatprep.mubr.f32.mxu0 %v849_v49 }
 0x103   : > { %v851_v7 = vmul.f32 %v2452_v43, %v742_v45  ;;  %v852_v42 = vmul.f32 %v2453_v23, %v747_v25 }
 0x105   : > { %2964 = vmatmul.mubr.f32.gmra.mrb[50].mxu0 %v850_v51 }
 0x106   : > { %v757_v38 = vpop.permute.xlu1 %756  ;;  %v752_v54 = vpop.permute.xlu0 %751  ;;  %2966 = vmatprep.mubr.f32.mxu0 %v851_v7 }
 0x107   : > { %v853_v31 = vmul.f32 %v2456_v1, %v752_v54  ;;  %v854_v53 = vmul.f32 %v2457_v14, %v757_v38  ;;  %v3997_v1 = vld [vmem:[%s4265_s4] ss:$0 sm:$0xff]  ;;  %v3018_v14 = vpop.f32.mrb[0].mxu1 }
 0x108   : > { %v1673_v52 = vpop.f32.mrb[1].mxu1 }
 0x109   : > { %2967 = vmatmul.mubr.f32.gmra.mrb[52].mxu0 %v852_v42  ;;  %v1674_v62 = vadd.f32 %v3997_v1, %v1673_v52 }
 0x10a   : > { %v767_v50 = vpop.permute.xlu1 %766  ;;  %v762_v56 = vpop.permute.xlu0 %761  ;;  %2969 = vmatprep.mubr.f32.mxu0 %v853_v31 }
 0x10b   : > { %v855_v43 = vmul.f32 %v2460_v28, %v762_v56  ;;  %v856_v59 = vmul.f32 %v2461_v19, %v767_v50  ;;  %v1679_v28 = vadd.f32 %v3018_v14, %v3997_v1  ;;  %1992 = vst [vmem:[%s4009_s17] sm:$0xff] %v1674_v62  ;;  %v3021_v19 = vpop.f32.mrb[2].mxu1 }
 0x10c   : > { %v1683_v21 = vpop.f32.mrb[3].mxu1 }
 0x10d   : > { %2970 = vmatmul.mubr.f32.gmra.mrb[54].mxu0 %v854_v53  ;;  %1993 = vst [vmem:[%s4009_s17 + $0x8] sm:$0xff] %v1679_v28  ;;  %v1684_v22 = vadd.f32 %v3997_v1, %v1683_v21 }
 0x10e   : > { %v777_v18 = vpop.permute.xlu1 %776  ;;  %v772_v23 = vpop.permute.xlu0 %771  ;;  %2972 = vmatprep.mubr.f32.mxu0 %v855_v43 }
 0x10f   : > { %v857_v63 = vmul.f32 %v2464_v57, %v772_v23  ;;  %v858_v2 = vmul.f32 %v2465_v24, %v777_v18  ;;  %v1689_v57 = vadd.f32 %v3021_v19, %v3997_v1  ;;  %1994 = vst [vmem:[%s4009_s17 + $0x10] sm:$0xff] %v1684_v22  ;;  %v3024_v60 = vpop.f32.mrb[4].mxu1 }
 0x110   : > { %v1699_v4 = vadd.f32 %v3024_v60, %v3997_v1  ;;  %v1693_v20 = vpop.f32.mrb[5].mxu1 }
 0x111   : > { %2973 = vmatmul.mubr.f32.gmra.mrb[56].mxu0 %v856_v59  ;;  %1995 = vst [vmem:[%s4009_s17 + $0x18] sm:$0xff] %v1689_v57  ;;  %v1694_v12 = vadd.f32 %v3997_v1, %v1693_v20 }
 0x112   : > { %v787_v5 = vpop.permute.xlu1 %786  ;;  %v782_v55 = vpop.permute.xlu0 %781  ;;  %2975 = vmatprep.mubr.f32.mxu0 %v857_v63  ;;  %1997 = vst [vmem:[%s4009_s17 + $0x28] sm:$0xff] %v1699_v4 }
 0x113   : > { %v859_v37 = vmul.f32 %v2468_v47, %v782_v55  ;;  %v860_v24 = vmul.f32 %v2469_v29, %v787_v5  ;;  %1996 = vst [vmem:[%s4009_s17 + $0x20] sm:$0xff] %v1694_v12  ;;  %v3027_v29 = vpop.f32.mrb[6].mxu1 }
 0x114   : > { %v1703_v32 = vpop.f32.mrb[7].mxu1 }
 0x115   : > { %2976 = vmatmul.mubr.f32.gmra.mrb[58].mxu0 %v858_v2  ;;  %v1704_v30 = vadd.f32 %v3997_v1, %v1703_v32 }
 0x116   : > { %v792_v0 = vpop.permute.xlu0 %791  ;;  %2978 = vmatprep.mubr.f32.mxu0 %v859_v37  ;;  %v797_v16 = vpop.permute.xlu1 %796 }
 0x117   : > { %v861_v47 = vmul.f32 %v2472_v61, %v792_v0  ;;  %v862_v9 = vmul.f32 %v2473_v34, %v797_v16  ;;  %v1709_v61 = vadd.f32 %v3027_v29, %v3997_v1  ;;  %1998 = vst [vmem:[%s4009_s17 + $0x30] sm:$0xff] %v1704_v30  ;;  %v3030_v36 = vpop.f32.mrb[8].mxu1 }
 0x118   : > { %v1719_v3 = vadd.f32 %v3030_v36, %v3997_v1  ;;  %v1713_v6 = vpop.f32.mrb[9].mxu1 }
 0x119   : > { %2979 = vmatmul.mubr.f32.gmra.mrb[60].mxu0 %v860_v24  ;;  %1999 = vst [vmem:[%s4009_s17 + $0x38] sm:$0xff] %v1709_v61  ;;  %v1714_v34 = vadd.f32 %v3997_v1, %v1713_v6 }
 0x11a   : > { %2981 = vmatprep.mubr.f32.mxu0 %v861_v47  ;;  %2001 = vst [vmem:[%s4009_s17 + $0x48] sm:$0xff] %v1719_v3 }
 0x11b   : > { %2000 = vst [vmem:[%s4009_s17 + $0x40] sm:$0xff] %v1714_v34  ;;  %v3033_v17 = vpop.f32.mrb[10].mxu1 }
 0x11c   : > { %v1729_v39 = vadd.f32 %v3033_v17, %v3997_v1  ;;  %v1723_v58 = vpop.f32.mrb[11].mxu1 }
 0x11d   : > { %2982 = vmatmul.mubr.f32.gmra.mrb[62].mxu0 %v862_v9  ;;  %v1724_v10 = vadd.f32 %v3997_v1, %v1723_v58 }
 0x11e   : > { %2003 = vst [vmem:[%s4009_s17 + $0x58] sm:$0xff] %v1729_v39 }
 0x11f   : > { %2002 = vst [vmem:[%s4009_s17 + $0x50] sm:$0xff] %v1724_v10  ;;  %v3036_v26 = vpop.f32.mrb[12].mxu1 }
 0x120   : > { %v1739_v15 = vadd.f32 %v3036_v26, %v3997_v1  ;;  %v1733_v13 = vpop.f32.mrb[13].mxu1 }
 0x121   : > { %v1734_v35 = vadd.f32 %v3997_v1, %v1733_v13 }
 0x122   : > { %2005 = vst [vmem:[%s4009_s17 + $0x68] sm:$0xff] %v1739_v15 }
 0x123   : > { %2004 = vst [vmem:[%s4009_s17 + $0x60] sm:$0xff] %v1734_v35  ;;  %v3039_v33 = vpop.f32.mrb[14].mxu1 }
 0x124   : > { %v1749_v41 = vadd.f32 %v3039_v33, %v3997_v1  ;;  %v1743_v44 = vpop.f32.mrb[15].mxu1 }
 0x125   : > { %v1744_v11 = vadd.f32 %v3997_v1, %v1743_v44 }
 0x126   : > { %2007 = vst [vmem:[%s4009_s17 + $0x78] sm:$0xff] %v1749_v41 }
 0x127   : > { %2006 = vst [vmem:[%s4009_s17 + $0x70] sm:$0xff] %v1744_v11  ;;  %v3042_v40 = vpop.f32.mrb[16].mxu1 }
 0x128   : > { %v1759_v8 = vadd.f32 %v3042_v40, %v3997_v1  ;;  %v1753_v27 = vpop.f32.mrb[17].mxu1 }
 0x129   : > { %v1754_v46 = vadd.f32 %v3997_v1, %v1753_v27 }
 0x12a   : > { %2009 = vst [vmem:[%s4009_s17 + $0x88] sm:$0xff] %v1759_v8 }
 0x12b   : > { %2008 = vst [vmem:[%s4009_s17 + $0x80] sm:$0xff] %v1754_v46  ;;  %v3045_v49 = vpop.f32.mrb[18].mxu1 }
 0x12c   : > { %v1769_v25 = vadd.f32 %v3045_v49, %v3997_v1  ;;  %v1763_v45 = vpop.f32.mrb[19].mxu1 }
 0x12d   : > { %v1764_v48 = vadd.f32 %v3997_v1, %v1763_v45 }
 0x12e   : > { %2011 = vst [vmem:[%s4009_s17 + $0x98] sm:$0xff] %v1769_v25 }
 0x12f   : > { %2010 = vst [vmem:[%s4009_s17 + $0x90] sm:$0xff] %v1764_v48  ;;  %v3048_v51 = vpop.f32.mrb[20].mxu1 }
 0x130   : > { %v1779_v7 = vadd.f32 %v3048_v51, %v3997_v1  ;;  %v1773_v38 = vpop.f32.mrb[21].mxu1 }
 0x131   : > { %v1774_v54 = vadd.f32 %v3997_v1, %v1773_v38 }
 0x132   : > { %2013 = vst [vmem:[%s4009_s17 + $0xa8] sm:$0xff] %v1779_v7 }
 0x133   : > { %2012 = vst [vmem:[%s4009_s17 + $0xa0] sm:$0xff] %v1774_v54  ;;  %v3051_v42 = vpop.f32.mrb[22].mxu1 }
 0x134   : > { %v1789_v31 = vadd.f32 %v3051_v42, %v3997_v1  ;;  %v1783_v50 = vpop.f32.mrb[23].mxu1 }
 0x135   : > { %v1784_v56 = vadd.f32 %v3997_v1, %v1783_v50 }
 0x136   : > { %2015 = vst [vmem:[%s4009_s17 + $0xb8] sm:$0xff] %v1789_v31 }
 0x137   : > { %2014 = vst [vmem:[%s4009_s17 + $0xb0] sm:$0xff] %v1784_v56  ;;  %v3054_v53 = vpop.f32.mrb[24].mxu1 }
 0x138   : > { %v1799_v43 = vadd.f32 %v3054_v53, %v3997_v1  ;;  %v1793_v18 = vpop.f32.mrb[25].mxu1 }
 0x139   : > { %v1794_v23 = vadd.f32 %v3997_v1, %v1793_v18 }
 0x13a   : > { %2017 = vst [vmem:[%s4009_s17 + $0xc8] sm:$0xff] %v1799_v43 }
 0x13b   : > { %2016 = vst [vmem:[%s4009_s17 + $0xc0] sm:$0xff] %v1794_v23  ;;  %v3057_v59 = vpop.f32.mrb[26].mxu1 }
 0x13c   : > { %v1809_v63 = vadd.f32 %v3057_v59, %v3997_v1  ;;  %v1803_v14 = vpop.f32.mrb[27].mxu1 }
 0x13d   : > { %v1804_v28 = vadd.f32 %v3997_v1, %v1803_v14 }
 0x13e   : > { %2019 = vst [vmem:[%s4009_s17 + $0xd8] sm:$0xff] %v1809_v63 }
 0x13f   : > { %2018 = vst [vmem:[%s4009_s17 + $0xd0] sm:$0xff] %v1804_v28  ;;  %v3060_v52 = vpop.f32.mrb[28].mxu1 }
 0x140   : > { %v1819_v5 = vadd.f32 %v3060_v52, %v3997_v1  ;;  %v1813_v55 = vpop.f32.mrb[29].mxu1 }
 0x141   : > { %v1814_v62 = vadd.f32 %v3997_v1, %v1813_v55 }
 0x142   : > { %2021 = vst [vmem:[%s4009_s17 + $0xe8] sm:$0xff] %v1819_v5 }
 0x143   : > { %2020 = vst [vmem:[%s4009_s17 + $0xe0] sm:$0xff] %v1814_v62  ;;  %v3063_v2 = vpop.f32.mrb[30].mxu1 }
 0x144   : > { %v1829_v37 = vadd.f32 %v3063_v2, %v3997_v1  ;;  %v1823_v19 = vpop.f32.mrb[31].mxu1 }
 0x145   : > { %v1824_v57 = vadd.f32 %v3997_v1, %v1823_v19 }
 0x146   : > { %2023 = vst [vmem:[%s4009_s17 + $0xf8] sm:$0xff] %v1829_v37 }
 0x147   : > { %2022 = vst [vmem:[%s4009_s17 + $0xf0] sm:$0xff] %v1824_v57  ;;  %v3066_v21 = vpop.f32.mrb[32].mxu1 }
 0x148   : > { %v1839_v0 = vadd.f32 %v3066_v21, %v3997_v1  ;;  %v1833_v22 = vpop.f32.mrb[33].mxu1 }
 0x149   : > { %v1834_v24 = vadd.f32 %v3997_v1, %v1833_v22 }
 0x14a   : > { %2025 = vst [vmem:[%s4009_s17 + $0x108] sm:$0xff] %v1839_v0 }
 0x14b   : > { %2024 = vst [vmem:[%s4009_s17 + $0x100] sm:$0xff] %v1834_v24  ;;  %v3069_v47 = vpop.f32.mrb[34].mxu1 }
 0x14c   : > { %v1849_v16 = vadd.f32 %v3069_v47, %v3997_v1  ;;  %v1843_v60 = vpop.f32.mrb[35].mxu1 }
 0x14d   : > { %v1844_v4 = vadd.f32 %v3997_v1, %v1843_v60 }
 0x14e   : > { %2027 = vst [vmem:[%s4009_s17 + $0x118] sm:$0xff] %v1849_v16 }
 0x14f   : > { %2026 = vst [vmem:[%s4009_s17 + $0x110] sm:$0xff] %v1844_v4  ;;  %v3072_v20 = vpop.f32.mrb[36].mxu1 }
 0x150   : > { %v1859_v12 = vadd.f32 %v3072_v20, %v3997_v1  ;;  %v1853_v9 = vpop.f32.mrb[37].mxu1 }
 0x151   : > { %v1854_v29 = vadd.f32 %v3997_v1, %v1853_v9 }
 0x152   : > { %2029 = vst [vmem:[%s4009_s17 + $0x128] sm:$0xff] %v1859_v12 }
 0x153   : > { %2028 = vst [vmem:[%s4009_s17 + $0x120] sm:$0xff] %v1854_v29 }
 0x158   : > { %v3075_v61 = vpop.f32.mrb[38].mxu1 }
 0x159   : > { %v1869_v32 = vadd.f32 %v3075_v61, %v3997_v1  ;;  %v1863_v30 = vpop.f32.mrb[39].mxu1 }
 0x15a   : > { %v1864_v36 = vadd.f32 %v3997_v1, %v1863_v30 }
 0x15b   : > { %2031 = vst [vmem:[%s4009_s17 + $0x138] sm:$0xff] %v1869_v32 }
 0x15c   : > { %2030 = vst [vmem:[%s4009_s17 + $0x130] sm:$0xff] %v1864_v36  ;;  %v3078_v3 = vpop.f32.mrb[40].mxu1 }
 0x15d   : > { %v1879_v6 = vadd.f32 %v3078_v3, %v3997_v1  ;;  %v1873_v34 = vpop.f32.mrb[41].mxu1 }
 0x15e   : > { %v1874_v17 = vadd.f32 %v3997_v1, %v1873_v34 }
 0x15f   : > { %2033 = vst [vmem:[%s4009_s17 + $0x148] sm:$0xff] %v1879_v6 }
 0x160   : > { %2032 = vst [vmem:[%s4009_s17 + $0x140] sm:$0xff] %v1874_v17  ;;  %v3081_v39 = vpop.f32.mrb[42].mxu1 }
 0x161   : > { %v1889_v58 = vadd.f32 %v3081_v39, %v3997_v1  ;;  %v1883_v10 = vpop.f32.mrb[43].mxu1 }
 0x162   : > { %v1884_v26 = vadd.f32 %v3997_v1, %v1883_v10 }
 0x163   : > { %2035 = vst [vmem:[%s4009_s17 + $0x158] sm:$0xff] %v1889_v58 }
 0x164   : > { %2034 = vst [vmem:[%s4009_s17 + $0x150] sm:$0xff] %v1884_v26  ;;  %v3084_v15 = vpop.f32.mrb[44].mxu1 }
 0x165   : > { %v1899_v13 = vadd.f32 %v3084_v15, %v3997_v1  ;;  %v1893_v35 = vpop.f32.mrb[45].mxu1 }
 0x166   : > { %v1894_v33 = vadd.f32 %v3997_v1, %v1893_v35 }
 0x167   : > { %2037 = vst [vmem:[%s4009_s17 + $0x168] sm:$0xff] %v1899_v13 }
 0x168   : > { %2036 = vst [vmem:[%s4009_s17 + $0x160] sm:$0xff] %v1894_v33  ;;  %v3087_v41 = vpop.f32.mrb[46].mxu1 }
 0x169   : > { %v1909_v44 = vadd.f32 %v3087_v41, %v3997_v1  ;;  %v1903_v11 = vpop.f32.mrb[47].mxu1 }
 0x16a   : > { %v1904_v40 = vadd.f32 %v3997_v1, %v1903_v11 }
 0x16b   : > { %2039 = vst [vmem:[%s4009_s17 + $0x178] sm:$0xff] %v1909_v44 }
 0x16c   : > { %2038 = vst [vmem:[%s4009_s17 + $0x170] sm:$0xff] %v1904_v40  ;;  %v3090_v8 = vpop.f32.mrb[48].mxu1 }
 0x16d   : > { %v1919_v27 = vadd.f32 %v3090_v8, %v3997_v1  ;;  %v1913_v46 = vpop.f32.mrb[49].mxu1 }
 0x16e   : > { %v1914_v49 = vadd.f32 %v3997_v1, %v1913_v46 }
 0x16f   : > { %2041 = vst [vmem:[%s4009_s17 + $0x188] sm:$0xff] %v1919_v27 }
 0x170   : > { %2040 = vst [vmem:[%s4009_s17 + $0x180] sm:$0xff] %v1914_v49  ;;  %v3093_v45 = vpop.f32.mrb[50].mxu1 }
 0x171   : > { %v1929_v51 = vadd.f32 %v3093_v45, %v3997_v1  ;;  %v1923_v7 = vpop.f32.mrb[51].mxu1 }
 0x172   : > { %v1924_v54 = vadd.f32 %v3997_v1, %v1923_v7 }
 0x173   : > { %2043 = vst [vmem:[%s4009_s17 + $0x198] sm:$0xff] %v1929_v51 }
 0x174   : > { %v2890_v25 = vpop.f32.mrb[0].mxu0  ;;  %2042 = vst [vmem:[%s4009_s17 + $0x190] sm:$0xff] %v1924_v54  ;;  %v3096_v31 = vpop.f32.mrb[52].mxu1 }
 0x175   : > { %v945_v48 = vpop.f32.mrb[1].mxu0  ;;  %v1939_v56 = vadd.f32 %v3096_v31, %v3997_v1  ;;  %v1933_v53 = vpop.f32.mrb[53].mxu1 }
 0x176   : > { %v2477_v38 = vpack.c.bf16 %v2890_v25, %v945_v48  ;;  %v1934_v18 = vadd.f32 %v3997_v1, %v1933_v53 }
 0x177   : > { %2045 = vst [vmem:[%s4009_s17 + $0x1a8] sm:$0xff] %v1939_v56 }
 0x178   : > { %2478 = vst [vmem:[%s4119_s19] sm:$0xff] %v2477_v38   ;;  %v2893_v42 = vpop.f32.mrb[2].mxu0  ;;  %2044 = vst [vmem:[%s4009_s17 + $0x1a0] sm:$0xff] %v1934_v18  ;;  %v3099_v59 = vpop.f32.mrb[54].mxu1 }
 0x179   : > { %v955_v50 = vpop.f32.mrb[3].mxu0  ;;  %v1949_v14 = vadd.f32 %v3099_v59, %v3997_v1  ;;  %v1943_v28 = vpop.f32.mrb[55].mxu1 }
 0x17a   : > { %v2482_v43 = vpack.c.bf16 %v2893_v42, %v955_v50  ;;  %v1944_v5 = vadd.f32 %v3997_v1, %v1943_v28 }
 0x17b   : > { %2047 = vst [vmem:[%s4009_s17 + $0x1b8] sm:$0xff] %v1949_v14 }
 0x17c   : > { %2665 = vst [vmem:[%s4119_s19 + $0x8] sm:$0xff] %v2482_v43   ;;  %v2896_v23 = vpop.f32.mrb[4].mxu0  ;;  %2046 = vst [vmem:[%s4009_s17 + $0x1b0] sm:$0xff] %v1944_v5  ;;  %v3102_v62 = vpop.f32.mrb[56].mxu1 }
 0x17d   : > { %v965_v63 = vpop.f32.mrb[5].mxu0  ;;  %v1959_v37 = vadd.f32 %v3102_v62, %v3997_v1  ;;  %v1953_v19 = vpop.f32.mrb[57].mxu1 }
 0x17e   : > { %v2487_v52 = vpack.c.bf16 %v2896_v23, %v965_v63  ;;  %v1954_v21 = vadd.f32 %v3997_v1, %v1953_v19 }
 0x17f   : > { %2049 = vst [vmem:[%s4009_s17 + $0x1c8] sm:$0xff] %v1959_v37 }
 0x180   : > { %2666 = vst [vmem:[%s4119_s19 + $0x10] sm:$0xff] %v2487_v52   ;;  %v2899_v55 = vpop.f32.mrb[6].mxu0  ;;  %2048 = vst [vmem:[%s4009_s17 + $0x1c0] sm:$0xff] %v1954_v21  ;;  %v3105_v22 = vpop.f32.mrb[58].mxu1 }
 0x181   : > { %v975_v2 = vpop.f32.mrb[7].mxu0  ;;  %v1969_v47 = vadd.f32 %v3105_v22, %v3997_v1  ;;  %v1963_v16 = vpop.f32.mrb[59].mxu1 }
 0x182   : > { %v2492_v57 = vpack.c.bf16 %v2899_v55, %v975_v2  ;;  %v1964_v4 = vadd.f32 %v3997_v1, %v1963_v16 }
 0x183   : > { %2051 = vst [vmem:[%s4009_s17 + $0x1d8] sm:$0xff] %v1969_v47 }
 0x184   : > { %2667 = vst [vmem:[%s4119_s19 + $0x18] sm:$0xff] %v2492_v57   ;;  %v2902_v0 = vpop.f32.mrb[8].mxu0  ;;  %2050 = vst [vmem:[%s4009_s17 + $0x1d0] sm:$0xff] %v1964_v4  ;;  %v3108_v12 = vpop.f32.mrb[60].mxu1 }
 0x185   : > { %v985_v24 = vpop.f32.mrb[9].mxu0  ;;  %v1979_v29 = vadd.f32 %v3108_v12, %v3997_v1  ;;  %v1973_v61 = vpop.f32.mrb[61].mxu1 }
 0x186   : > { %v2497_v60 = vpack.c.bf16 %v2902_v0, %v985_v24  ;;  %v1974_v30 = vadd.f32 %v3997_v1, %v1973_v61 }
 0x187   : > { %2053 = vst [vmem:[%s4009_s17 + $0x1e8] sm:$0xff] %v1979_v29 }
 0x188   : > { %2668 = vst [vmem:[%s4119_s19 + $0x20] sm:$0xff] %v2497_v60   ;;  %v2905_v20 = vpop.f32.mrb[10].mxu0  ;;  %2052 = vst [vmem:[%s4009_s17 + $0x1e0] sm:$0xff] %v1974_v30  ;;  %v3111_v3 = vpop.f32.mrb[62].mxu1 }
 0x189   : > { %v995_v9 = vpop.f32.mrb[11].mxu0  ;;  %v1989_v34 = vadd.f32 %v3111_v3, %v3997_v1  ;;  %v1983_v17 = vpop.f32.mrb[63].mxu1 }
 0x18a   : > { %v2502_v32 = vpack.c.bf16 %v2905_v20, %v995_v9  ;;  %v1984_v58 = vadd.f32 %v3997_v1, %v1983_v17 }
 0x18b   : > { %2055 = vst [vmem:[%s4009_s17 + $0x1f8] sm:$0xff] %v1989_v34 }
 0x18c   : > { %2669 = vst [vmem:[%s4119_s19 + $0x28] sm:$0xff] %v2502_v32   ;;  %v2908_v36 = vpop.f32.mrb[12].mxu0  ;;  %2054 = vst [vmem:[%s4009_s17 + $0x1f0] sm:$0xff] %v1984_v58 }
 0x18d   : > { %v1005_v6 = vpop.f32.mrb[13].mxu0 }
 0x18e   : > { %v2507_v39 = vpack.c.bf16 %v2908_v36, %v1005_v6 }
 0x190   : > { %2670 = vst [vmem:[%s4119_s19 + $0x30] sm:$0xff] %v2507_v39   ;;  %v2911_v10 = vpop.f32.mrb[14].mxu0 }
 0x191   : > { %v1015_v26 = vpop.f32.mrb[15].mxu0 }
 0x192   : > { %3240 = shalt.err (!%p3237_p3)
}
 0x193   : > { %s3241_s16 = scalar_lea.hbm %s4154_s9, 8192  ;;  %s3245_s20 = scalar_lea.hbm %s4267_s6, 16384 }
 0x194   : > { %p3242_p4 = scmp.ne.s32.totalorder %s4154_s9, %s3241_s16  ;;  %p3246_p9 = scmp.lt.u32.totalorder %s4154_s9, %s4267_s6 }
 0x195   : > { %p3247_p10 = scmp.lt.u32.totalorder %s3245_s20, %s3241_s16  ;;  %p3249_p12 = scmp.lt.u32.totalorder %s3241_s16, %s4154_s9 }
 0x196   : > { %p3243_p7 = pnand %p3242_p4, %p3403_p5 }
 0x197   : > { %p3248_p11 = por %p3247_p10, %p3246_p9 }
 0x198   : > { %p3244_p8 = pneg %p3243_p7 }
 0x199   : > { %p3250_p13 = por %p3249_p12, %p3248_p11 }
 0x19b   : > { %p3251_p0 = pnand %p3250_p13, %p3244_p8 }
 0x19d   : > { %3254 = shalt.err (!%p3251_p0)
}
 0x19e   : > { %s3325_s11 = smov 128   ;;  %s3326_s12 = smov 8   ;;  %v2512_v1 = vpack.c.bf16 %v2911_v10, %v1015_v26  ;;  %v2914_v15 = vpop.f32.mrb[16].mxu0 }
 0x19f   : > { %3177 = dma.vmem_to_hbm [thread:$0]  (%p3403_p5), %s4156_s26, 8192, %s4154_s9, %s2062_s10, %s3325_s11, %s3325_s11, %s3326_s12   ;;  %v1025_v13 = vpop.f32.mrb[17].mxu0 }
 0x1a0   : > { %2671 = vst [vmem:[%s4119_s19 + $0x38] sm:$0xff] %v2512_v1   ;;  %v2517_v35 = vpack.c.bf16 %v2914_v15, %v1025_v13  ;;  %v2917_v33 = vpop.f32.mrb[18].mxu0  ;;  %s2344_s26 = sshll.u32 %s3386_s25, 12  ;;  %s2075_s9 = sshll.u32 %s4119_s19, 4  ;;  %s4217_s9 = int_to_ptr.vmem [resolvable:$true] %s2075_s9 }
 0x1a1   : > { %v1035_v41 = vpop.f32.mrb[19].mxu0  ;;  %s4215_s14 = scalar_lea.hbm %s4266_s5, %s2344_s26  ;;  %s2057_s16 = scalar_lea.sflag [#allocation3], %s3987_s29 }
 0x1a2   : > { %2672 = vst [vmem:[%s4119_s19 + $0x40] sm:$0xff] %v2517_v35   ;;  %v2522_v44 = vpack.c.bf16 %v2917_v33, %v1035_v41  ;;  %v2920_v11 = vpop.f32.mrb[20].mxu0  ;;  %s3255_s17 = scalar_lea.vmem %s4217_s9, 4096  ;;  %s3327_s25 = smov [#allocation2]  }
 0x1a3   : > { %v1045_v40 = vpop.f32.mrb[21].mxu0  ;;  %p3256_p1 = scmp.ne.s32.totalorder %s4217_s9, %s3255_s17  ;;  %s3259_s18 = sshll.u32 %s3327_s25, 4  ;;  %s3260_s18 = int_to_ptr.vmem [resolvable:$false] %s3259_s18 }
 0x1a4   : > { %2673 = vst [vmem:[%s4119_s19 + $0x48] sm:$0xff] %v2522_v44   ;;  %v2527_v8 = vpack.c.bf16 %v2920_v11, %v1045_v40  ;;  %v2923_v27 = vpop.f32.mrb[22].mxu0  ;;  %s3261_s20 = scalar_lea.vmem %s3260_s18, 8192  ;;  %p3262_p4 = scmp.lt.s32.totalorder %s4217_s9, %s3260_s18 }
 0x1a5   : > { %v1055_v46 = vpop.f32.mrb[23].mxu0  ;;  %p3257_p2 = pnand %p3256_p1, %p3403_p5  ;;  %p3263_p7 = scmp.lt.s32.totalorder %s3261_s20, %s3255_s17 }
 0x1a6   : > { %2674 = vst [vmem:[%s4119_s19 + $0x50] sm:$0xff] %v2527_v8   ;;  %v2532_v49 = vpack.c.bf16 %v2923_v27, %v1055_v46  ;;  %v2926_v25 = vpop.f32.mrb[24].mxu0 }
 0x1a7   : > { %v1065_v45 = vpop.f32.mrb[25].mxu0  ;;  %p3258_p3 = pneg %p3257_p2  ;;  %p3264_p8 = por %p3263_p7, %p3262_p4 }
 0x1a8   : > { %2675 = vst [vmem:[%s4119_s19 + $0x58] sm:$0xff] %v2532_v49   ;;  %v2537_v48 = vpack.c.bf16 %v2926_v25, %v1065_v45  ;;  %v2929_v51 = vpop.f32.mrb[26].mxu0 }
 0x1a9   : > { %v1075_v7 = vpop.f32.mrb[27].mxu0  ;;  %p3265_p9 = pnand %p3264_p8, %p3258_p3 }
 0x1aa   : > { %2676 = vst [vmem:[%s4119_s19 + $0x60] sm:$0xff] %v2537_v48   ;;  %v2542_v38 = vpack.c.bf16 %v2929_v51, %v1075_v7 }
 0x1ac   : > { %2677 = vst [vmem:[%s4119_s19 + $0x68] sm:$0xff] %v2542_v38   ;;  %v2932_v54 = vpop.f32.mrb[28].mxu0 }
 0x1ad   : > { %v1085_v42 = vpop.f32.mrb[29].mxu0 }
 0x1ae   : > { %v2547_v31 = vpack.c.bf16 %v2932_v54, %v1085_v42 }
 0x1b0   : > { %2678 = vst [vmem:[%s4119_s19 + $0x70] sm:$0xff] %v2547_v31   ;;  %v2935_v50 = vpop.f32.mrb[30].mxu0 }
 0x1b1   : > { %v1095_v56 = vpop.f32.mrb[31].mxu0 }
 0x1b2   : > { %v2552_v53 = vpack.c.bf16 %v2935_v50, %v1095_v56 }
 0x1b4   : > { %2679 = vst [vmem:[%s4119_s19 + $0x78] sm:$0xff] %v2552_v53   ;;  %v2938_v43 = vpop.f32.mrb[32].mxu0 }
 0x1b5   : > { %v1105_v18 = vpop.f32.mrb[33].mxu0 }
 0x1b6   : > { %v2557_v23 = vpack.c.bf16 %v2938_v43, %v1105_v18 }
 0x1b8   : > { %2680 = vst [vmem:[%s4119_s19 + $0x80] sm:$0xff] %v2557_v23   ;;  %v2941_v59 = vpop.f32.mrb[34].mxu0 }
 0x1b9   : > { %v1115_v63 = vpop.f32.mrb[35].mxu0 }
 0x1ba   : > { %v2562_v14 = vpack.c.bf16 %v2941_v59, %v1115_v63 }
 0x1bc   : > { %2681 = vst [vmem:[%s4119_s19 + $0x88] sm:$0xff] %v2562_v14   ;;  %v2944_v28 = vpop.f32.mrb[36].mxu0 }
 0x1bd   : > { %v1125_v52 = vpop.f32.mrb[37].mxu0 }
 0x1be   : > { %v2567_v5 = vpack.c.bf16 %v2944_v28, %v1125_v52 }
 0x1c0   : > { %2682 = vst [vmem:[%s4119_s19 + $0x90] sm:$0xff] %v2567_v5   ;;  %v2947_v55 = vpop.f32.mrb[38].mxu0 }
 0x1c1   : > { %v1135_v62 = vpop.f32.mrb[39].mxu0 }
 0x1c2   : > { %v2572_v2 = vpack.c.bf16 %v2947_v55, %v1135_v62 }
 0x1c4   : > { %2683 = vst [vmem:[%s4119_s19 + $0x98] sm:$0xff] %v2572_v2   ;;  %v2950_v37 = vpop.f32.mrb[40].mxu0 }
 0x1c5   : > { %v1145_v19 = vpop.f32.mrb[41].mxu0 }
 0x1c6   : > { %v2577_v57 = vpack.c.bf16 %v2950_v37, %v1145_v19 }
 0x1c8   : > { %2684 = vst [vmem:[%s4119_s19 + $0xa0] sm:$0xff] %v2577_v57   ;;  %v2953_v21 = vpop.f32.mrb[42].mxu0 }
 0x1c9   : > { %v1155_v0 = vpop.f32.mrb[43].mxu0 }
 0x1ca   : > { %v2582_v22 = vpack.c.bf16 %v2953_v21, %v1155_v0 }
 0x1cc   : > { %2685 = vst [vmem:[%s4119_s19 + $0xa8] sm:$0xff] %v2582_v22   ;;  %v2956_v24 = vpop.f32.mrb[44].mxu0 }
 0x1cd   : > { %v1165_v47 = vpop.f32.mrb[45].mxu0 }
 0x1ce   : > { %v2587_v16 = vpack.c.bf16 %v2956_v24, %v1165_v47 }
 0x1d0   : > { %2686 = vst [vmem:[%s4119_s19 + $0xb0] sm:$0xff] %v2587_v16   ;;  %v2959_v60 = vpop.f32.mrb[46].mxu0 }
 0x1d1   : > { %v1175_v4 = vpop.f32.mrb[47].mxu0 }
 0x1d2   : > { %v2592_v20 = vpack.c.bf16 %v2959_v60, %v1175_v4 }
 0x1d4   : > { %2687 = vst [vmem:[%s4119_s19 + $0xb8] sm:$0xff] %v2592_v20   ;;  %v2962_v12 = vpop.f32.mrb[48].mxu0 }
 0x1d5   : > { %v1185_v9 = vpop.f32.mrb[49].mxu0 }
 0x1d6   : > { %v2597_v29 = vpack.c.bf16 %v2962_v12, %v1185_v9 }
 0x1d8   : > { %2688 = vst [vmem:[%s4119_s19 + $0xc0] sm:$0xff] %v2597_v29   ;;  %v2965_v61 = vpop.f32.mrb[50].mxu0 }
 0x1d9   : > { %v1195_v32 = vpop.f32.mrb[51].mxu0 }
 0x1da   : > { %v2602_v30 = vpack.c.bf16 %v2965_v61, %v1195_v32 }
 0x1dc   : > { %2689 = vst [vmem:[%s4119_s19 + $0xc8] sm:$0xff] %v2602_v30   ;;  %v2968_v36 = vpop.f32.mrb[52].mxu0 }
 0x1dd   : > { %v1205_v3 = vpop.f32.mrb[53].mxu0 }
 0x1de   : > { %v2607_v6 = vpack.c.bf16 %v2968_v36, %v1205_v3 }
 0x1e0   : > { %2690 = vst [vmem:[%s4119_s19 + $0xd0] sm:$0xff] %v2607_v6   ;;  %v2971_v34 = vpop.f32.mrb[54].mxu0 }
 0x1e1   : > { %v1215_v17 = vpop.f32.mrb[55].mxu0 }
 0x1e2   : > { %v2612_v39 = vpack.c.bf16 %v2971_v34, %v1215_v17 }
 0x1e4   : > { %2691 = vst [vmem:[%s4119_s19 + $0xd8] sm:$0xff] %v2612_v39   ;;  %v2974_v58 = vpop.f32.mrb[56].mxu0 }
 0x1e5   : > { %v1225_v10 = vpop.f32.mrb[57].mxu0 }
 0x1e6   : > { %v2617_v26 = vpack.c.bf16 %v2974_v58, %v1225_v10 }
 0x1e8   : > { %2692 = vst [vmem:[%s4119_s19 + $0xe0] sm:$0xff] %v2617_v26   ;;  %v2977_v1 = vpop.f32.mrb[58].mxu0 }
 0x1e9   : > { %v1235_v15 = vpop.f32.mrb[59].mxu0 }
 0x1ea   : > { %v2622_v13 = vpack.c.bf16 %v2977_v1, %v1235_v15 }
 0x1ec   : > { %2693 = vst [vmem:[%s4119_s19 + $0xe8] sm:$0xff] %v2622_v13   ;;  %v2980_v35 = vpop.f32.mrb[60].mxu0 }
 0x1ed   : > { %v1245_v33 = vpop.f32.mrb[61].mxu0 }
 0x1ee   : > { %v2627_v41 = vpack.c.bf16 %v2980_v35, %v1245_v33 }
 0x1f0   : > { %2694 = vst [vmem:[%s4119_s19 + $0xf0] sm:$0xff] %v2627_v41   ;;  %v2983_v44 = vpop.f32.mrb[62].mxu0 }
 0x1f1   : > { %v1255_v11 = vpop.f32.mrb[63].mxu0 }
 0x1f2   : > { %v2632_v40 = vpack.c.bf16 %v2983_v44, %v1255_v11 }
 0x1f4   : > { %2695 = vst [vmem:[%s4119_s19 + $0xf8] sm:$0xff] %v2632_v40  }
 0x1f5   : > { %3268 = shalt.err (!%p3265_p9)
}
 0x1f6   : > { %s3269_s19 = scalar_lea.hbm %s4215_s14, 4096  ;;  %s3273_s11 = scalar_lea.hbm %s4266_s5, 8192 }
 0x1f7   : > { %p3270_p10 = scmp.ne.s32.totalorder %s4215_s14, %s3269_s19  ;;  %p3274_p13 = scmp.lt.u32.totalorder %s4215_s14, %s4266_s5 }
 0x1f8   : > { %p3275_p0 = scmp.lt.u32.totalorder %s3273_s11, %s3269_s19  ;;  %p3277_p2 = scmp.lt.u32.totalorder %s3269_s19, %s4215_s14 }
 0x1f9   : > { %p3271_p11 = pnand %p3270_p10, %p3403_p5 }
 0x1fa   : > { %p3276_p1 = por %p3275_p0, %p3274_p13 }
 0x1fb   : > { %p3272_p12 = pneg %p3271_p11 }
 0x1fc   : > { %p3278_p3 = por %p3277_p2, %p3276_p1 }
 0x1fe   : > { %p3279_p4 = pnand %p3278_p3, %p3272_p12 }
 0x200   : > { %3282 = shalt.err (!%p3279_p4)
}
 0x201   : > { %s3328_s10 = smov 64   ;;  %s3329_s13 = smov 4  }
 0x202   : > { %3176 = dma.vmem_to_hbm [thread:$0]  (%p3403_p5), %s4217_s9, 4096, %s4215_s14, %s2057_s16, %s3328_s10, %s3328_s10, %s3329_s13  }
 0x203 PF: > { %p3187_p7 = scmp.ge.s32.totalorder %s3321_s24, 2  ;;  %s2106_s17 = sand.u32 1, %s3309_s21  }
 0x204   : > { %s2107_s25 = scalar_lea.sflag [#allocation3], %s2106_s17 }
 0x205   : > { %p3181_p8 = pnand %p3187_p7, %p3407_p6 }
 0x207   : > { %3300 = dma.done.wait (!%p3181_p8), %s2107_s25, 4096  }
 0x208   : > { %3302 = vsyncadd (!%p3181_p8), %s2107_s25, 4294963200  ;;  %s2116_s18 = scalar_lea.sflag [#allocation5], %s2106_s17 }
 0x209   : > { %3304 = dma.done.wait (!%p3181_p8), %s2116_s18, 8192  }
 0x20a   : > { %3306 = vsyncadd (!%p3181_p8), %s2116_s18, 4294959104  ;;  %p20_p5 = scmp.ge.s32.totalorder %s3390_s27, 4   ;;  %s4316_s21 = smov %s3313_s22 }
 0x20b   : > { %s4317_s22 = smov %s3317_s23  ;;  %s4318_s23 = smov %s3401_s30 }
 0x20c   : > { %s4319_s24 = smov %s3390_s27  ;;  %22 = sbr.rel (!%p20_p5) target bundleno = 5 (0x5), region = 95 }
 0x213   :  { %2121 = vsyncpa [#allocation3], 1 }
 0x214   :  { %2123 = vsyncpa [#allocation3 + $0x1], 1 }
 0x215   :  { %2124 = vsyncpa [#allocation5], 1 }
 0x216   :  { %2126 = vsyncpa [#allocation5 + $0x1], 1 }

</bundles_post_ra>
